<compile_context>
chip_gen: v7x
topology: tpu7x:2x2x1
jax: 0.10.0
libtpu: 0.0.40
codegen_flags: <defaults>
</compile_context>

<pallas_src>
import jax
import jax.numpy as jnp
from jax.experimental import pallas as pl
from jax.experimental.pallas import tpu as pltpu

OBS_DIM = 8        # LunarLanderContinuous-v2 observation_space.shape = (8,)
ACT_DIM = 2        # LunarLanderContinuous-v2 action_space.shape[0]   = 2
FC1_DIMS = 1024
FC2_DIMS = 512
PAD_OUT = 128      # fc3 output padded to one full lane tile


def actor_mlp_kernel(x_ref, w1_ref, b1_ref, w2_ref, b2_ref, w3_ref, b3_ref,
                     o_ref):
    # bf16 MXU inputs, f32 accumulate, f32 elementwise (native on v5e/v6e/v7x).
    x = x_ref[...].astype(jnp.bfloat16)                          # (TB, 8)

    h1 = jnp.dot(x, w1_ref[...], preferred_element_type=jnp.float32)
    h1 = jnp.maximum(h1 + b1_ref[...], 0.0)                      # (TB, 1024)

    h2 = jnp.dot(h1.astype(jnp.bfloat16), w2_ref[...],
                 preferred_element_type=jnp.float32)
    h2 = jnp.maximum(h2 + b2_ref[...], 0.0)                      # (TB, 512)

    h3 = jnp.dot(h2.astype(jnp.bfloat16), w3_ref[...],
                 preferred_element_type=jnp.float32)
    o_ref[...] = jnp.tanh(h3 + b3_ref[...]).astype(o_ref.dtype)  # (TB, 128)


def _round_up(x, m):
    return ((x + m - 1) // m) * m


def prepare_params(params):
    """Cast weights to bf16 and lane-pad fc3 to a full 128-lane tile."""
    w1, b1, w2, b2, w3, b3 = params
    w1b = w1.astype(jnp.bfloat16)
    w2b = w2.astype(jnp.bfloat16)
    w3p = jnp.zeros((FC2_DIMS, PAD_OUT), jnp.bfloat16)
    w3p = w3p.at[:, :ACT_DIM].set(w3.astype(jnp.bfloat16))
    b3p = jnp.zeros((1, PAD_OUT), jnp.float32).at[:, :ACT_DIM].set(b3)
    return (w1b, b1, w2b, b2, w3p, b3p)


def actor_forward(x, prepped):
    """x: (B, 8) f32 observations -> (B, 2) f32 actions."""
    w1b, b1, w2b, b2, w3p, b3p = prepped
    B = x.shape[0]

    # Batch tile: cap at 128 rows per grid step, keep it a multiple of 8.
    tb = 128 if B >= 128 else _round_up(max(B, 1), 8)
    b_pad = _round_up(B, tb)
    if b_pad != B:
        x = jnp.pad(x, ((0, b_pad - B), (0, 0)))
    grid = (b_pad // tb,)

    resident = lambda i: (0, 0)   # constant block index -> weights stay in VMEM

    out = pl.pallas_call(
        actor_mlp_kernel,
        out_shape=jax.ShapeDtypeStruct((b_pad, PAD_OUT), jnp.float32),
        grid=grid,
        in_specs=[
            pl.BlockSpec((tb, OBS_DIM), lambda i: (i, 0)),        # x
            pl.BlockSpec((OBS_DIM, FC1_DIMS), resident),          # w1 (bf16)
            pl.BlockSpec((1, FC1_DIMS), resident),                # b1 (f32)
            pl.BlockSpec((FC1_DIMS, FC2_DIMS), resident),         # w2 (bf16)
            pl.BlockSpec((1, FC2_DIMS), resident),                # b2 (f32)
            pl.BlockSpec((FC2_DIMS, PAD_OUT), resident),          # w3 padded
            pl.BlockSpec((1, PAD_OUT), resident),                 # b3 padded
        ],
        out_specs=pl.BlockSpec((tb, PAD_OUT), lambda i: (i, 0)),
        compiler_params=pltpu.CompilerParams(
            dimension_semantics=("parallel",),
            vmem_limit_bytes=8 << 20,
        ),
    )(x, w1b, b1, w2b, b2, w3p, b3p)

    return out[:B, :ACT_DIM]


def init_params(key):
    """PyTorch nn.Linear default init: U(-1/sqrt(fan_in), 1/sqrt(fan_in))."""
    ks = jax.random.split(key, 6)

    def linear(kw, kb, fan_in, fan_out):
        bound = 1.0 / jnp.sqrt(fan_in)
        w = jax.random.uniform(kw, (fan_in, fan_out), jnp.float32,
                               minval=-bound, maxval=bound)
        b = jax.random.uniform(kb, (1, fan_out), jnp.float32,
                               minval=-bound, maxval=bound)
        return w, b

    w1, b1 = linear(ks[0], ks[1], OBS_DIM, FC1_DIMS)
    w2, b2 = linear(ks[2], ks[3], FC1_DIMS, FC2_DIMS)
    w3, b3 = linear(ks[4], ks[5], FC2_DIMS, ACT_DIM)
    return (w1, b1, w2, b2, w3, b3)


# TODO(synk): Adam optimizer / MSELoss from the PyTorch module are training
# machinery, not part of the forward pass, and are not implemented here.

if __name__ == "__main__":
    key = jax.random.PRNGKey(0)
    k_params, k_x = jax.random.split(key)

    params = init_params(k_params)         # f32 master params
    prepped = prepare_params(params)       # bf16 weights, fc3 lane-padded

    batch = 2
    x = jax.random.normal(k_x, (batch, OBS_DIM), jnp.float32)

    out = jax.block_until_ready(actor_forward(x, prepped))
    assert out.shape == (batch, ACT_DIM)

    w1, b1, w2, b2, w3, b3 = params

    # Reference with the same bf16 weight rounding the kernel sees.
    hi = jax.lax.Precision.HIGHEST
    w1r = w1.astype(jnp.bfloat16).astype(jnp.float32)
    w2r = w2.astype(jnp.bfloat16).astype(jnp.float32)
    w3r = w3.astype(jnp.bfloat16).astype(jnp.float32)
    xr = x.astype(jnp.bfloat16).astype(jnp.float32)
    h1 = jnp.maximum(jnp.dot(xr, w1r, precision=hi) + b1, 0.0)
    h2 = jnp.maximum(
        jnp.dot(h1.astype(jnp.bfloat16).astype(jnp.float32), w2r, precision=hi)
        + b2, 0.0)
    ref_bf16 = jnp.tanh(
        jnp.dot(h2.astype(jnp.bfloat16).astype(jnp.float32), w3r, precision=hi)
        + b3)
    assert jnp.allclose(out, ref_bf16, atol=5e-3, rtol=5e-3)

    # Semantic sanity check vs. the full-f32 PyTorch-equivalent forward.
    ref_f32 = jnp.tanh(
        jnp.maximum(jnp.maximum(x @ w1 + b1, 0.0) @ w2 + b2, 0.0) @ w3 + b3)
    assert jnp.allclose(out, ref_f32, atol=5e-2, rtol=5e-2)

    print("KERNEL_OK")
</pallas_src>

<mosaic_0001>
module attributes {stable_mosaic.version = 11 : i64} {
  func.func @actor_mlp_kernel(%arg0: i32, %arg1: memref<8x8xf32, #tpu.memory_space<vmem>>, %arg2: memref<8x1024xbf16, #tpu.memory_space<vmem>>, %arg3: memref<1x1024xf32, #tpu.memory_space<vmem>>, %arg4: memref<1024x512xbf16, #tpu.memory_space<vmem>>, %arg5: memref<1x512xf32, #tpu.memory_space<vmem>>, %arg6: memref<512x128xbf16, #tpu.memory_space<vmem>>, %arg7: memref<1x128xf32, #tpu.memory_space<vmem>>, %arg8: memref<8x128xf32, #tpu.memory_space<vmem>>) attributes {dimension_semantics = [#tpu.dimension_semantics<parallel>], iteration_bounds = array<i64: 1>, scalar_prefetch = 0 : i64, scratch_operands = 0 : i64, tpu.core_type = #tpu.core_type<tc>, window_params = [{transform_indices = @transform_0, window_bounds = array<i64: 8, 8>}, {pipeline_mode = #tpu.pipeline_mode<synchronous>, transform_indices = @transform_1, window_bounds = array<i64: 8, 1024>}, {pipeline_mode = #tpu.pipeline_mode<synchronous>, transform_indices = @transform_2, window_bounds = array<i64: 1, 1024>}, {pipeline_mode = #tpu.pipeline_mode<synchronous>, transform_indices = @transform_3, window_bounds = array<i64: 1024, 512>}, {pipeline_mode = #tpu.pipeline_mode<synchronous>, transform_indices = @transform_4, window_bounds = array<i64: 1, 512>}, {pipeline_mode = #tpu.pipeline_mode<synchronous>, transform_indices = @transform_5, window_bounds = array<i64: 512, 128>}, {pipeline_mode = #tpu.pipeline_mode<synchronous>, transform_indices = @transform_6, window_bounds = array<i64: 1, 128>}, {transform_indices = @transform_7, window_bounds = array<i64: 8, 128>}]} {
    %c0 = arith.constant 0 : index
    %c0_0 = arith.constant 0 : index
    %0 = vector.load %arg1[%c0, %c0_0] : memref<8x8xf32, #tpu.memory_space<vmem>>, vector<8x8xf32>
    %1 = arith.truncf %0 : vector<8x8xf32> to vector<8x8xbf16>
    %c0_1 = arith.constant 0 : index
    %c0_2 = arith.constant 0 : index
    %2 = vector.load %arg2[%c0_1, %c0_2] : memref<8x1024xbf16, #tpu.memory_space<vmem>>, vector<8x1024xbf16>
    %cst = arith.constant dense<0.000000e+00> : vector<8x1024xf32>
    %3 = tpu.matmul %1, %2, %cst {dimension_numbers = #tpu.dot_dimension_numbers<[1], [0], [0], [1], [0, 0, 1, 1], [], []>} : vector<8x8xbf16>, vector<8x1024xbf16>, vector<8x1024xf32> -> vector<8x1024xf32>
    %c0_3 = arith.constant 0 : index
    %c0_4 = arith.constant 0 : index
    %4 = vector.load %arg3[%c0_3, %c0_4] : memref<1x1024xf32, #tpu.memory_space<vmem>>, vector<1x1024xf32>
    %5 = vector.broadcast %4 : vector<1x1024xf32> to vector<8x1024xf32>
    %6 = arith.addf %3, %5 : vector<8x1024xf32>
    %cst_5 = arith.constant 0.000000e+00 : f32
    %7 = vector.broadcast %cst_5 : f32 to vector<8x1024xf32>
    %8 = arith.maximumf %6, %7 : vector<8x1024xf32>
    %9 = arith.truncf %8 : vector<8x1024xf32> to vector<8x1024xbf16>
    %c0_6 = arith.constant 0 : index
    %c0_7 = arith.constant 0 : index
    %10 = vector.load %arg4[%c0_6, %c0_7] : memref<1024x512xbf16, #tpu.memory_space<vmem>>, vector<1024x512xbf16>
    %cst_8 = arith.constant dense<0.000000e+00> : vector<8x512xf32>
    %11 = tpu.matmul %9, %10, %cst_8 {dimension_numbers = #tpu.dot_dimension_numbers<[1], [0], [0], [1], [0, 0, 1, 1], [], []>} : vector<8x1024xbf16>, vector<1024x512xbf16>, vector<8x512xf32> -> vector<8x512xf32>
    %c0_9 = arith.constant 0 : index
    %c0_10 = arith.constant 0 : index
    %12 = vector.load %arg5[%c0_9, %c0_10] : memref<1x512xf32, #tpu.memory_space<vmem>>, vector<1x512xf32>
    %13 = vector.broadcast %12 : vector<1x512xf32> to vector<8x512xf32>
    %14 = arith.addf %11, %13 : vector<8x512xf32>
    %cst_11 = arith.constant 0.000000e+00 : f32
    %15 = vector.broadcast %cst_11 : f32 to vector<8x512xf32>
    %16 = arith.maximumf %14, %15 : vector<8x512xf32>
    %17 = arith.truncf %16 : vector<8x512xf32> to vector<8x512xbf16>
    %c0_12 = arith.constant 0 : index
    %c0_13 = arith.constant 0 : index
    %18 = vector.load %arg6[%c0_12, %c0_13] : memref<512x128xbf16, #tpu.memory_space<vmem>>, vector<512x128xbf16>
    %cst_14 = arith.constant dense<0.000000e+00> : vector<8x128xf32>
    %19 = tpu.matmul %17, %18, %cst_14 {dimension_numbers = #tpu.dot_dimension_numbers<[1], [0], [0], [1], [0, 0, 1, 1], [], []>} : vector<8x512xbf16>, vector<512x128xbf16>, vector<8x128xf32> -> vector<8x128xf32>
    %c0_15 = arith.constant 0 : index
    %c0_16 = arith.constant 0 : index
    %20 = vector.load %arg7[%c0_15, %c0_16] : memref<1x128xf32, #tpu.memory_space<vmem>>, vector<1x128xf32>
    %21 = vector.broadcast %20 : vector<1x128xf32> to vector<8x128xf32>
    %22 = arith.addf %19, %21 : vector<8x128xf32>
    %23 = math.tanh %22 : vector<8x128xf32>
    %c0_17 = arith.constant 0 : index
    %c0_18 = arith.constant 0 : index
    %24 = vector.load %arg8[%c0_17, %c0_18] : memref<8x128xf32, #tpu.memory_space<vmem>>, vector<8x128xf32>
    tpu.vector_store %arg8[%c0_17, %c0_18], %23 {strides = array<i32>} : memref<8x128xf32, #tpu.memory_space<vmem>>, vector<8x128xf32>,
    return
  }
  func.func @transform_0(%arg0: i32) -> (i32, i32) {
    %c0_i32 = arith.constant 0 : i32
    %c0_i32_0 = arith.constant 0 : i32
    return %arg0, %c0_i32 : i32, i32
  }
  func.func @transform_1(%arg0: i32) -> (i32, i32) {
    %c0_i32 = arith.constant 0 : i32
    %c0_i32_0 = arith.constant 0 : i32
    %c0_i32_1 = arith.constant 0 : i32
    return %c0_i32, %c0_i32_0 : i32, i32
  }
  func.func @transform_2(%arg0: i32) -> (i32, i32) {
    %c0_i32 = arith.constant 0 : i32
    %c0_i32_0 = arith.constant 0 : i32
    %c0_i32_1 = arith.constant 0 : i32
    return %c0_i32, %c0_i32_0 : i32, i32
  }
  func.func @transform_3(%arg0: i32) -> (i32, i32) {
    %c0_i32 = arith.constant 0 : i32
    %c0_i32_0 = arith.constant 0 : i32
    %c0_i32_1 = arith.constant 0 : i32
    return %c0_i32, %c0_i32_0 : i32, i32
  }
  func.func @transform_4(%arg0: i32) -> (i32, i32) {
    %c0_i32 = arith.constant 0 : i32
    %c0_i32_0 = arith.constant 0 : i32
    %c0_i32_1 = arith.constant 0 : i32
    return %c0_i32, %c0_i32_0 : i32, i32
  }
  func.func @transform_5(%arg0: i32) -> (i32, i32) {
    %c0_i32 = arith.constant 0 : i32
    %c0_i32_0 = arith.constant 0 : i32
    %c0_i32_1 = arith.constant 0 : i32
    return %c0_i32, %c0_i32_0 : i32, i32
  }
  func.func @transform_6(%arg0: i32) -> (i32, i32) {
    %c0_i32 = arith.constant 0 : i32
    %c0_i32_0 = arith.constant 0 : i32
    %c0_i32_1 = arith.constant 0 : i32
    return %c0_i32, %c0_i32_0 : i32, i32
  }
  func.func @transform_7(%arg0: i32) -> (i32, i32) {
    %c0_i32 = arith.constant 0 : i32
    %c0_i32_0 = arith.constant 0 : i32
    return %arg0, %c0_i32 : i32, i32
  }
}

</mosaic_0001>

<bundles_post_ra>
// kernel: tpu_custom_call.1
= control target key start
LH: loop header
LB: loop body
LE: loop exit
PB: predicated region body
PF: predicated region fallthrough
CT: control target
= control target key end

     0   :  { %12 = vsyncpa [#allocation3], 0  ;;  %s3776_s0 = inlined_call_operand.hbm [shape: f32[8,8], index: 0, kind: input, shape index: {}]   ;;  %s3777_s1 = inlined_call_operand.hbm [shape: bf16[8,1024], index: 1, kind: input, shape index: {}]   ;;  %s3778_s2 = inlined_call_operand.hbm [shape: f32[1,1024], index: 2, kind: input, shape index: {}]   ;;  %s3779_s3 = inlined_call_operand.hbm [shape: bf16[1024,512], index: 3, kind: input, shape index: {}]   ;;  %s3780_s4 = inlined_call_operand.vmem [shape: f32[1,512], index: 4, kind: input, shape index: {}]   ;;  %s3781_s5 = inlined_call_operand.hbm [shape: bf16[512,128], index: 5, kind: input, shape index: {}]   ;;  %s3782_s6 = inlined_call_operand.vmem [shape: f32[1,128], index: 6, kind: input, shape index: {}]   ;;  %s3783_s7 = inlined_call_operand.hbm [shape: f32[8,128], index: 7, kind: output, shape index: {}]  }
   0x1   :  { %13 = vsyncpa [#allocation6], 0 }
   0x2   :  { %14 = vsyncpa [#allocation9], 0 }
   0x3   :  { %15 = vsyncpa [#allocation4], 0  ;;  %s3577_s24 = smov [#allocation5]   ;;  %s3578_s26 = smov [#allocation8]  }
   0x4   :  { %s32_s25 = sshll.u32 %s3577_s24, 4  ;;  %s51_s27 = sshll.u32 %s3578_s26, 4  ;;  %s33_s25 = int_to_ptr.vmem [resolvable:$true] %s32_s25  ;;  %s3628_s27 = int_to_ptr.vmem [resolvable:$true] %s51_s27 }
   0x5   :  { %s3437_s30 = scalar_lea.hbm %s3777_s1, 512 }
   0x6   :  { %p3438_p0 = scmp.ne.s32.totalorder %s3777_s1, %s3437_s30  ;;  %p3441_p1 = scmp.lt.u32.totalorder %s3437_s30, %s3777_s1 }
   0x8   :  { %p3443_p2 = pnand %p3441_p1, %p3438_p0 }
   0xa   :  { %3446 = shalt.err (!%p3443_p2)
}
   0xb   :  { %s3447_s12 = scalar_lea.vmem %s33_s25, 512  ;;  %p3452_p4 = scmp.lt.s32.totalorder %s33_s25, %s33_s25 }
   0xc   :  { %p3448_p3 = scmp.ne.s32.totalorder %s33_s25, %s3447_s12  ;;  %p3453_p5 = scmp.lt.s32.totalorder %s3447_s12, %s3447_s12 }
   0xe   :  { %p3454_p6 = por %p3453_p5, %p3452_p4 }
  0x10   :  { %p3455_p7 = pnand %p3454_p6, %p3448_p3 }
  0x12   :  { %3458 = shalt.err (!%p3455_p7)
}
  0x13   :  { %35 = dma.hbm_to_vmem [thread:$0]  %s3777_s1, 512, %s33_s25, [#allocation6]  }
  0x14   :  { %s3459_s17 = scalar_lea.hbm %s3779_s3, 32768 }
  0x15   :  { %p3460_p8 = scmp.ne.s32.totalorder %s3779_s3, %s3459_s17  ;;  %p3463_p9 = scmp.lt.u32.totalorder %s3459_s17, %s3779_s3 }
  0x17   :  { %p3465_p10 = pnand %p3463_p9, %p3460_p8 }
  0x19   :  { %3468 = shalt.err (!%p3465_p10)
}
  0x1a   :  { %s3469_s22 = scalar_lea.vmem %s3628_s27, 32768  ;;  %p3474_p12 = scmp.lt.s32.totalorder %s3628_s27, %s3628_s27 }
  0x1b   :  { %p3470_p11 = scmp.ne.s32.totalorder %s3628_s27, %s3469_s22  ;;  %p3475_p13 = scmp.lt.s32.totalorder %s3469_s22, %s3469_s22 }
  0x1d   :  { %p3476_p0 = por %p3475_p13, %p3474_p12 }
  0x1f   :  { %p3477_p1 = pnand %p3476_p0, %p3470_p11 }
  0x21   :  { %3480 = shalt.err (!%p3477_p1)
}
  0x22   :  { %s3579_s1 = smov 256   ;;  %s3580_s23 = smov 16  }
  0x23   :  { %57 = dma.hbm_to_vmem [thread:$0]  %s3779_s3, 32768, %s3628_s27, [#allocation9], %s3579_s1, %s3579_s1, %s3580_s23  }
  0x24   :  { %s3581_s26 = smov [#allocation2]   ;;  %s3582_s29 = smov [#allocation7]  }
  0x25   :  { %s22_s28 = sshll.u32 %s3581_s26, 4  ;;  %s42_s30 = sshll.u32 %s3582_s29, 4  ;;  %s23_s28 = int_to_ptr.vmem [resolvable:$true] %s22_s28  ;;  %s43_s30 = int_to_ptr.vmem [resolvable:$true] %s42_s30 }
  0x26   :  { %s3481_s10 = scalar_lea.hbm %s3776_s0, 128 }
  0x27   :  { %p3482_p2 = scmp.ne.s32.totalorder %s3776_s0, %s3481_s10  ;;  %p3485_p3 = scmp.lt.u32.totalorder %s3481_s10, %s3776_s0 }
  0x29   :  { %p3487_p4 = pnand %p3485_p3, %p3482_p2 }
  0x2b   :  { %3490 = shalt.err (!%p3487_p4)
}
  0x2c   :  { %s3491_s3 = scalar_lea.vmem %s23_s28, 128  ;;  %p3496_p6 = scmp.lt.s32.totalorder %s23_s28, %s23_s28 }
  0x2d   :  { %p3492_p5 = scmp.ne.s32.totalorder %s23_s28, %s3491_s3  ;;  %p3497_p7 = scmp.lt.s32.totalorder %s3491_s3, %s3491_s3 }
  0x2f   :  { %p3498_p8 = por %p3497_p7, %p3496_p6 }
  0x31   :  { %p3499_p9 = pnand %p3498_p8, %p3492_p5 }
  0x33   :  { %3502 = shalt.err (!%p3499_p9)
}
  0x34   :  { %25 = dma.hbm_to_vmem [thread:$0]  %s3776_s0, 128, %s23_s28, [#allocation3]  }
  0x35   :  { %s3503_s18 = scalar_lea.hbm %s3778_s2, 128 }
  0x36   :  { %p3504_p10 = scmp.ne.s32.totalorder %s3778_s2, %s3503_s18  ;;  %p3507_p11 = scmp.lt.u32.totalorder %s3503_s18, %s3778_s2 }
  0x38   :  { %p3509_p12 = pnand %p3507_p11, %p3504_p10 }
  0x3a   :  { %3512 = shalt.err (!%p3509_p12)
}
  0x3b   :  { %s3513_s1 = scalar_lea.vmem %s43_s30, 128  ;;  %p3518_p0 = scmp.lt.s32.totalorder %s43_s30, %s43_s30 }
  0x3c   :  { %p3514_p13 = scmp.ne.s32.totalorder %s43_s30, %s3513_s1  ;;  %p3519_p1 = scmp.lt.s32.totalorder %s3513_s1, %s3513_s1 }
  0x3e   :  { %p3520_p2 = por %p3519_p1, %p3518_p0 }
  0x40   :  { %p3521_p3 = pnand %p3520_p2, %p3514_p13 }
  0x42   :  { %3524 = shalt.err (!%p3521_p3)
}
  0x43   :  { %45 = dma.hbm_to_vmem [thread:$0]  %s3778_s2, 128, %s43_s30, [#allocation6]  }
  0x44   :  { %s3583_s24 = smov [#allocation10]   ;;  %s3525_s29 = scalar_lea.hbm %s3781_s5, 4096 }
  0x45   :  { %s65_s25 = sshll.u32 %s3583_s24, 4  ;;  %p3526_p4 = scmp.ne.s32.totalorder %s3781_s5, %s3525_s29  ;;  %s66_s25 = int_to_ptr.vmem [resolvable:$true] %s65_s25 }
  0x46   :  { %p3529_p5 = scmp.lt.u32.totalorder %s3525_s29, %s3781_s5 }
  0x48   :  { %p3531_p6 = pnand %p3529_p5, %p3526_p4 }
  0x4a   :  { %3534 = shalt.err (!%p3531_p6)
}
  0x4b   :  { %s3535_s12 = scalar_lea.vmem %s66_s25, 4096  ;;  %p3540_p8 = scmp.lt.s32.totalorder %s66_s25, %s66_s25 }
  0x4c   :  { %p3536_p7 = scmp.ne.s32.totalorder %s66_s25, %s3535_s12  ;;  %p3541_p9 = scmp.lt.s32.totalorder %s3535_s12, %s3535_s12 }
  0x4e   :  { %p3542_p10 = por %p3541_p9, %p3540_p8 }
  0x50   :  { %p3543_p11 = pnand %p3542_p10, %p3536_p7 }
  0x52   :  { %3546 = shalt.err (!%p3543_p11)
}
  0x53   :  { %s3584_s2 = smov 64   ;;  %s3585_s30 = smov 4  }
  0x54   :  { %71 = dma.hbm_to_vmem [thread:$0]  %s3781_s5, 4096, %s66_s25, [#allocation9], %s3584_s2, %s3584_s2, %s3585_s30  }
  0x55   :  { %3569 = dma.done.wait [#allocation3], 128  }
  0x56   :  { %3570 = vsyncadd [#allocation3], 4294967168 }
  0x57   :  { %3571 = dma.done.wait [#allocation6], 640  }
  0x58   :  { %3572 = vsyncadd [#allocation6], 4294966656 }
  0x59   :  { %3573 = dma.done.wait [#allocation9], 36864  }
  0x5a   :  { %3574 = vsyncadd [#allocation9], 4294930432  ;;  %v3586_v0 = vmov 0   ;;  %v92_v1 = vld [vmem:[#allocation5] sm:$0xff]  ;;  %vm162_vm0 = vcmask 1043456   ;;  %v90_v2 = vld [vmem:[#allocation2] sm:$0xff] }
  0x5b   :  { %219 = vmatprep.mubr.bf16.mxu0 %v3586_v0  ;;  %260 = vmatprep.mubr.bf16.mxu1 %v3586_v0  ;;  %v93_v3 = vld [vmem:[#allocation5 + $0x8] sm:$0xff]  ;;  %v2624_v4 = vcombine.high %v92_v1, %v92_v1  ;;  %v2623_v5 = vcombine.low %v92_v1, %v92_v1  ;;  %v94_v7 = vld [vmem:[#allocation5 + $0x10] sm:$0xff]  ;;  %v95_v8 = vld [vmem:[#allocation5 + $0x18] sm:$0xff]  ;;  %v91_v14 = vpack.c.bf16 %v90_v2, %v90_v2  ;;  %vm158_vm1 = vcmask 64512   ;;  %s3587_s15 = smov [#allocation11]  }
  0x5c   :  { %v2626_v6 = vcombine.high %v93_v3, %v93_v3  ;;  %v2625_v9 = vcombine.low %v93_v3, %v93_v3  ;;  %v2628_v10 = vcombine.high %v94_v7, %v94_v7  ;;  %v2627_v11 = vcombine.low %v94_v7, %v94_v7  ;;  %v3021_v19 = vld [vmem:[#allocation8 + $0x4] ss:$16 sps:$4 sm:$0xff]   ;;  %v3024_v20 = vld [vmem:[#allocation8 + $0xc] ss:$16 sps:$4 sm:$0xff]   ;;  %v3019_v21 = vld [vmem:[#allocation8] ss:$16 sps:$4 sm:$0xff]  }
  0x5d   :  { %v2630_v12 = vcombine.high %v95_v8, %v95_v8  ;;  %2631 = vmatprep.subr.msk.bf16.mxu0 %vm162_vm0, %v2624_v4  ;;  %v164_v13 = vsel %vm162_vm0, %v2623_v5, 0  ;;  %v2629_v15 = vcombine.low %v95_v8, %v95_v8  ;;  %v3022_v22 = vld [vmem:[#allocation8 + $0x8] ss:$16 sps:$4 sm:$0xff]   ;;  %v3027_v23 = vld [vmem:[#allocation8 + $0x24] ss:$16 sps:$4 sm:$0xff]   ;;  %s2612_s16 = sshll.u32 %s3587_s15, 4  ;;  %s2613_s16 = int_to_ptr.vmem [resolvable:$true] %s2612_s16 }
  0x5e   :  { %2633 = vmatprep.subr.msk.bf16.mxu1 %vm162_vm0, %v2626_v6  ;;  %188 = vmatpush1.bf16.msra.mxu0 %v164_v13  ;;  %v170_v16 = vsel %vm162_vm0, %v2625_v9, 0  ;;  %v176_v17 = vsel %vm162_vm0, %v2627_v11, 0  ;;  %v3030_v24 = vld [vmem:[#allocation8 + $0x2c] ss:$16 sps:$4 sm:$0xff]   ;;  %v3025_v25 = vld [vmem:[#allocation8 + $0x20] ss:$16 sps:$4 sm:$0xff]   ;;  %p3552_p13 = scmp.lt.s32.totalorder %s2613_s16, %s2613_s16 }
  0x5f   :  { %229 = vmatpush1.bf16.msra.mxu1 %v170_v16  ;;  %2635 = vmatprep.subr.msk.bf16.mxu0 %vm162_vm0, %v2628_v10  ;;  %v182_v18 = vsel %vm162_vm0, %v2629_v15, 0  ;;  %v3028_v26 = vld [vmem:[#allocation8 + $0x28] ss:$16 sps:$4 sm:$0xff]   ;;  %v3033_v27 = vld [vmem:[#allocation8 + $0x44] ss:$16 sps:$4 sm:$0xff]   ;;  %s3547_s17 = scalar_lea.vmem %s2613_s16, 128 }
  0x60   :  { %2637 = vmatprep.subr.msk.bf16.mxu1 %vm162_vm0, %v2630_v12  ;;  %v3036_v28 = vld [vmem:[#allocation8 + $0x4c] ss:$16 sps:$4 sm:$0xff]   ;;  %v3031_v29 = vld [vmem:[#allocation8 + $0x40] ss:$16 sps:$4 sm:$0xff]   ;;  %v3034_v30 = vld [vmem:[#allocation8 + $0x48] ss:$16 sps:$4 sm:$0xff]   ;;  %p3548_p12 = scmp.ne.s32.totalorder %s2613_s16, %s3547_s17  ;;  %p3553_p0 = scmp.lt.s32.totalorder %s3547_s17, %s3547_s17 }
  0x61   :  { %2632 = vmatmul.mubr.msk.bf16.vlgmr.msra.gmra.mrb[0].mxu0 %vm158_vm1, %v91_v14  ;;  %v3039_v31 = vld [vmem:[#allocation8 + $0x64] ss:$16 sps:$4 sm:$0xff]   ;;  %v3042_v32 = vld [vmem:[#allocation8 + $0x6c] ss:$16 sps:$4 sm:$0xff]   ;;  %v3037_v33 = vld [vmem:[#allocation8 + $0x60] ss:$16 sps:$4 sm:$0xff]  }
  0x62   :  { %2634 = vmatmul.mubr.msk.bf16.vlgmr.msra.gmra.mrb[0].mxu1 %vm158_vm1, %v91_v14  ;;  %270 = vmatpush1.bf16.msra.mxu0 %v176_v17  ;;  %v3040_v34 = vld [vmem:[#allocation8 + $0x68] ss:$16 sps:$4 sm:$0xff]   ;;  %v3045_v35 = vld [vmem:[#allocation8 + $0x84] ss:$16 sps:$4 sm:$0xff]   ;;  %v3048_v36 = vld [vmem:[#allocation8 + $0x8c] ss:$16 sps:$4 sm:$0xff]   ;;  %p3554_p1 = por %p3553_p0, %p3552_p13 }
  0x63   :  { %301 = vmatprep.mubr.bf16.mxu0 %v3586_v0  ;;  %311 = vmatpush1.bf16.msra.mxu1 %v182_v18  ;;  %v3043_v37 = vld [vmem:[#allocation8 + $0x80] ss:$16 sps:$4 sm:$0xff]   ;;  %v3046_v38 = vld [vmem:[#allocation8 + $0x88] ss:$16 sps:$4 sm:$0xff]   ;;  %v3051_v39 = vld [vmem:[#allocation8 + $0xa4] ss:$16 sps:$4 sm:$0xff]  }
  0x64   :  { %342 = vmatprep.mubr.bf16.mxu1 %v3586_v0  ;;  %1925 = vmatprep.subr.bf16.mxu0 %v3021_v19  ;;  %v3054_v40 = vld [vmem:[#allocation8 + $0xac] ss:$16 sps:$4 sm:$0xff]   ;;  %v3049_v41 = vld [vmem:[#allocation8 + $0xa0] ss:$16 sps:$4 sm:$0xff]   ;;  %v3052_v42 = vld [vmem:[#allocation8 + $0xa8] ss:$16 sps:$4 sm:$0xff]   ;;  %p3555_p2 = pnand %p3554_p1, %p3548_p12 }
  0x65   :  { %2089 = vmatprep.subr.bf16.mxu1 %v3024_v20  ;;  %v3057_v43 = vld [vmem:[#allocation8 + $0xc4] ss:$16 sps:$4 sm:$0xff]   ;;  %v3060_v44 = vld [vmem:[#allocation8 + $0xcc] ss:$16 sps:$4 sm:$0xff]   ;;  %v3055_v45 = vld [vmem:[#allocation8 + $0xc0] ss:$16 sps:$4 sm:$0xff]  }
  0x66   :  { %v3058_v46 = vld [vmem:[#allocation8 + $0xc8] ss:$16 sps:$4 sm:$0xff]   ;;  %v3063_v47 = vld [vmem:[#allocation8 + $0xe4] ss:$16 sps:$4 sm:$0xff]   ;;  %v3061_v48 = vld [vmem:[#allocation8 + $0xe0] ss:$16 sps:$4 sm:$0xff]  }
  0x67   :  { %v3066_v49 = vld [vmem:[#allocation8 + $0xec] ss:$16 sps:$4 sm:$0xff]   ;;  %v3064_v50 = vld [vmem:[#allocation8 + $0xe8] ss:$16 sps:$4 sm:$0xff]   ;;  %v3069_v51 = vld [vmem:[#allocation8 + $0x104] ss:$16 sps:$4 sm:$0xff]  }
  0x68   :  { %v3072_v52 = vld [vmem:[#allocation8 + $0x10c] ss:$16 sps:$4 sm:$0xff]   ;;  %v3067_v53 = vld [vmem:[#allocation8 + $0x100] ss:$16 sps:$4 sm:$0xff]   ;;  %v3070_v54 = vld [vmem:[#allocation8 + $0x108] ss:$16 sps:$4 sm:$0xff]  }
  0x69   :  { %2636 = vmatmul.mubr.msk.bf16.vlgmr.msra.gmra.mrb[4].mxu0 %vm158_vm1, %v91_v14  ;;  %v3075_v55 = vld [vmem:[#allocation8 + $0x124] ss:$16 sps:$4 sm:$0xff]   ;;  %v3078_v56 = vld [vmem:[#allocation8 + $0x12c] ss:$16 sps:$4 sm:$0xff]   ;;  %v3073_v57 = vld [vmem:[#allocation8 + $0x120] ss:$16 sps:$4 sm:$0xff]  }
  0x6a   :  { %2638 = vmatmul.mubr.msk.bf16.vlgmr.msra.gmra.mrb[4].mxu1 %vm158_vm1, %v91_v14  ;;  %1926 = vmatpush1.bf16.msra.mxu0 %v3019_v21  ;;  %v3076_v58 = vld [vmem:[#allocation8 + $0x128] ss:$16 sps:$4 sm:$0xff]   ;;  %v3081_v59 = vld [vmem:[#allocation8 + $0x144] ss:$16 sps:$4 sm:$0xff]   ;;  %v3084_v60 = vld [vmem:[#allocation8 + $0x14c] ss:$16 sps:$4 sm:$0xff]   ;;  %v98_v21 = vlaneseq }
  0x6b   :  { %2090 = vmatpush1.bf16.msra.mxu1 %v3022_v22  ;;  %1927 = vmatprep.subr.bf16.mxu0 %v3027_v23  ;;  %v3079_v61 = vld [vmem:[#allocation8 + $0x140] ss:$16 sps:$4 sm:$0xff]   ;;  %v3082_v62 = vld [vmem:[#allocation8 + $0x148] ss:$16 sps:$4 sm:$0xff]   ;;  %v3087_v63 = vld [vmem:[#allocation8 + $0x164] ss:$16 sps:$4 sm:$0xff]  }
  0x6c   :  { %2091 = vmatprep.subr.bf16.mxu1 %v3030_v24  ;;  %v3090_v0 = vld [vmem:[#allocation8 + $0x16c] ss:$16 sps:$4 sm:$0xff]   ;;  %v3085_v1 = vld [vmem:[#allocation8 + $0x160] ss:$16 sps:$4 sm:$0xff]   ;;  %v3088_v2 = vld [vmem:[#allocation8 + $0x168] ss:$16 sps:$4 sm:$0xff]  }
  0x6d   :  { %v3093_v3 = vld [vmem:[#allocation8 + $0x184] ss:$16 sps:$4 sm:$0xff]   ;;  %v3096_v4 = vld [vmem:[#allocation8 + $0x18c] ss:$16 sps:$4 sm:$0xff]   ;;  %v3091_v5 = vld [vmem:[#allocation8 + $0x180] ss:$16 sps:$4 sm:$0xff]  }
  0x6e   :  { %1928 = vmatpush1.bf16.msra.mxu0 %v3025_v25  ;;  %v3094_v6 = vld [vmem:[#allocation8 + $0x188] ss:$16 sps:$4 sm:$0xff]   ;;  %v3099_v7 = vld [vmem:[#allocation8 + $0x1a4] ss:$16 sps:$4 sm:$0xff]   ;;  %v3102_v8 = vld [vmem:[#allocation8 + $0x1ac] ss:$16 sps:$4 sm:$0xff]  }
  0x6f   :  { %2092 = vmatpush1.bf16.msra.mxu1 %v3028_v26  ;;  %1929 = vmatprep.subr.bf16.mxu0 %v3033_v27  ;;  %v3097_v9 = vld [vmem:[#allocation8 + $0x1a0] ss:$16 sps:$4 sm:$0xff]   ;;  %v3100_v10 = vld [vmem:[#allocation8 + $0x1a8] ss:$16 sps:$4 sm:$0xff]   ;;  %v3105_v11 = vld [vmem:[#allocation8 + $0x1c4] ss:$16 sps:$4 sm:$0xff]  }
  0x70   :  { %2093 = vmatprep.subr.bf16.mxu1 %v3036_v28  ;;  %v3108_v12 = vld [vmem:[#allocation8 + $0x1cc] ss:$16 sps:$4 sm:$0xff]   ;;  %v3103_v13 = vld [vmem:[#allocation8 + $0x1c0] ss:$16 sps:$4 sm:$0xff]   ;;  %v3106_v14 = vld [vmem:[#allocation8 + $0x1c8] ss:$16 sps:$4 sm:$0xff]  }
  0x71   :  { %v3111_v15 = vld [vmem:[#allocation8 + $0x1e4] ss:$16 sps:$4 sm:$0xff]   ;;  %v3114_v16 = vld [vmem:[#allocation8 + $0x1ec] ss:$16 sps:$4 sm:$0xff]   ;;  %v3109_v17 = vld [vmem:[#allocation8 + $0x1e0] ss:$16 sps:$4 sm:$0xff]  }
  0x72   :  { %1930 = vmatpush1.bf16.msra.mxu0 %v3031_v29  ;;  %v3112_v18 = vld [vmem:[#allocation8 + $0x1e8] ss:$16 sps:$4 sm:$0xff]   ;;  %v3117_v19 = vld [vmem:[#allocation8 + $0x204] ss:$16 sps:$4 sm:$0xff]   ;;  %v3120_v20 = vld [vmem:[#allocation8 + $0x20c] ss:$16 sps:$4 sm:$0xff]  }
  0x73   :  { %2094 = vmatpush1.bf16.msra.mxu1 %v3034_v30  ;;  %1931 = vmatprep.subr.bf16.mxu0 %v3039_v31  ;;  %v3707_v22 = vshrl.u32 %v98_v21, 7  ;;  %v3710_v24 = vld [vmem:[#allocation7] sm:$0xff]  ;;  %v3165_v21 = vld [vmem:[#allocation8 + $0x304] ss:$16 sps:$4 sm:$0xff]  }
  0x74   :  { %2095 = vmatprep.subr.bf16.mxu1 %v3042_v32 }
  0x75   :  { %v100_v23 = vsub.s32 0, %v3707_v22  ;;  %v104_v25 = vsub.s32 1, %v3707_v22  ;;  %v112_v26 = vsub.s32 3, %v3707_v22 }
  0x76   :  { %1932 = vmatpush1.bf16.msra.mxu0 %v3037_v33 }
  0x77   :  { %2096 = vmatpush1.bf16.msra.mxu1 %v3040_v34  ;;  %1933 = vmatprep.subr.bf16.mxu0 %v3045_v35  ;;  %v101_v27 = vrot.slane %v3710_v24, %v100_v23  ;;  %v105_v28 = vrot.slane %v3710_v24, %v104_v25  ;;  %v113_v29 = vrot.slane %v3710_v24, %v112_v26 }
  0x78   :  { %2097 = vmatprep.subr.bf16.mxu1 %v3048_v36 }
  0x7a   :  { %1934 = vmatpush1.bf16.msra.mxu0 %v3043_v37 }
  0x7b   :  { %2098 = vmatpush1.bf16.msra.mxu1 %v3046_v38  ;;  %1935 = vmatprep.subr.bf16.mxu0 %v3051_v39 }
  0x7c   :  { %2099 = vmatprep.subr.bf16.mxu1 %v3054_v40 }
  0x7e   :  { %1936 = vmatpush1.bf16.msra.mxu0 %v3049_v41 }
  0x7f   :  { %2100 = vmatpush1.bf16.msra.mxu1 %v3052_v42  ;;  %1937 = vmatprep.subr.bf16.mxu0 %v3057_v43 }
  0x80   :  { %2101 = vmatprep.subr.bf16.mxu1 %v3060_v44 }
  0x82   :  { %1938 = vmatpush1.bf16.msra.mxu0 %v3055_v45  ;;  %v3115_v45 = vld [vmem:[#allocation8 + $0x200] ss:$16 sps:$4 sm:$0xff]  }
  0x83   :  { %2102 = vmatpush1.bf16.msra.mxu1 %v3058_v46  ;;  %1939 = vmatprep.subr.bf16.mxu0 %v3063_v47  ;;  %v3118_v46 = vld [vmem:[#allocation8 + $0x208] ss:$16 sps:$4 sm:$0xff]  }
  0x84   :  { %2103 = vmatprep.subr.bf16.mxu1 %v3066_v49  ;;  %v3126_v49 = vld [vmem:[#allocation8 + $0x22c] ss:$16 sps:$4 sm:$0xff]  }
  0x86   :  { %1940 = vmatpush1.bf16.msra.mxu0 %v3061_v48  ;;  %v3123_v48 = vld [vmem:[#allocation8 + $0x224] ss:$16 sps:$4 sm:$0xff]  }
  0x87   :  { %2104 = vmatpush1.bf16.msra.mxu1 %v3064_v50  ;;  %1941 = vmatprep.subr.bf16.mxu0 %v3069_v51 }
  0x88   :  { %2105 = vmatprep.subr.bf16.mxu1 %v3072_v52 }
  0x8a   :  { %1942 = vmatpush1.bf16.msra.mxu0 %v3067_v53  ;;  %v3121_v53 = vld [vmem:[#allocation8 + $0x220] ss:$16 sps:$4 sm:$0xff]  }
  0x8b   :  { %2106 = vmatpush1.bf16.msra.mxu1 %v3070_v54  ;;  %1943 = vmatprep.subr.bf16.mxu0 %v3075_v55  ;;  %v3124_v54 = vld [vmem:[#allocation8 + $0x228] ss:$16 sps:$4 sm:$0xff]  }
  0x8c   :  { %2107 = vmatprep.subr.bf16.mxu1 %v3078_v56  ;;  %v3129_v56 = vld [vmem:[#allocation8 + $0x244] ss:$16 sps:$4 sm:$0xff]  }
  0x8e   :  { %1944 = vmatpush1.bf16.msra.mxu0 %v3073_v57  ;;  %v3132_v57 = vld [vmem:[#allocation8 + $0x24c] ss:$16 sps:$4 sm:$0xff]  }
  0x8f   :  { %2108 = vmatpush1.bf16.msra.mxu1 %v3076_v58  ;;  %1945 = vmatprep.subr.bf16.mxu0 %v3081_v59  ;;  %v3127_v59 = vld [vmem:[#allocation8 + $0x240] ss:$16 sps:$4 sm:$0xff]  }
  0x90   :  { %2109 = vmatprep.subr.bf16.mxu1 %v3084_v60  ;;  %v3130_v60 = vld [vmem:[#allocation8 + $0x248] ss:$16 sps:$4 sm:$0xff]  }
  0x92   :  { %1946 = vmatpush1.bf16.msra.mxu0 %v3079_v61  ;;  %v3135_v61 = vld [vmem:[#allocation8 + $0x264] ss:$16 sps:$4 sm:$0xff]  }
  0x93   :  { %2110 = vmatpush1.bf16.msra.mxu1 %v3082_v62  ;;  %1947 = vmatprep.subr.bf16.mxu0 %v3087_v63  ;;  %v3138_v62 = vld [vmem:[#allocation8 + $0x26c] ss:$16 sps:$4 sm:$0xff]   ;;  %v3133_v63 = vld [vmem:[#allocation8 + $0x260] ss:$16 sps:$4 sm:$0xff]  }
  0x94   :  { %2111 = vmatprep.subr.bf16.mxu1 %v3090_v0  ;;  %v3136_v0 = vld [vmem:[#allocation8 + $0x268] ss:$16 sps:$4 sm:$0xff]  }
  0x96   :  { %1948 = vmatpush1.bf16.msra.mxu0 %v3085_v1  ;;  %v3141_v1 = vld [vmem:[#allocation8 + $0x284] ss:$16 sps:$4 sm:$0xff]  }
  0x97   :  { %2112 = vmatpush1.bf16.msra.mxu1 %v3088_v2  ;;  %1949 = vmatprep.subr.bf16.mxu0 %v3093_v3  ;;  %v3144_v2 = vld [vmem:[#allocation8 + $0x28c] ss:$16 sps:$4 sm:$0xff]   ;;  %v3139_v3 = vld [vmem:[#allocation8 + $0x280] ss:$16 sps:$4 sm:$0xff]  }
  0x98   :  { %2113 = vmatprep.subr.bf16.mxu1 %v3096_v4  ;;  %v3142_v4 = vld [vmem:[#allocation8 + $0x288] ss:$16 sps:$4 sm:$0xff]  }
  0x9a   :  { %1950 = vmatpush1.bf16.msra.mxu0 %v3091_v5  ;;  %v3147_v5 = vld [vmem:[#allocation8 + $0x2a4] ss:$16 sps:$4 sm:$0xff]  }
  0x9b   :  { %2114 = vmatpush1.bf16.msra.mxu1 %v3094_v6  ;;  %1951 = vmatprep.subr.bf16.mxu0 %v3099_v7  ;;  %v3150_v6 = vld [vmem:[#allocation8 + $0x2ac] ss:$16 sps:$4 sm:$0xff]   ;;  %v3145_v7 = vld [vmem:[#allocation8 + $0x2a0] ss:$16 sps:$4 sm:$0xff]  }
  0x9c   :  { %2115 = vmatprep.subr.bf16.mxu1 %v3102_v8  ;;  %v3148_v8 = vld [vmem:[#allocation8 + $0x2a8] ss:$16 sps:$4 sm:$0xff]  }
  0x9e   :  { %1952 = vmatpush1.bf16.msra.mxu0 %v3097_v9 }
  0x9f   :  { %2116 = vmatpush1.bf16.msra.mxu1 %v3100_v10  ;;  %1953 = vmatprep.subr.bf16.mxu0 %v3105_v11  ;;  %v3153_v10 = vld [vmem:[#allocation8 + $0x2c4] ss:$16 sps:$4 sm:$0xff]   ;;  %v3156_v11 = vld [vmem:[#allocation8 + $0x2cc] ss:$16 sps:$4 sm:$0xff]  }
  0xa0   :  { %2117 = vmatprep.subr.bf16.mxu1 %v3108_v12 }
  0xa2   :  { %1954 = vmatpush1.bf16.msra.mxu0 %v3103_v13 }
  0xa3   :  { %2118 = vmatpush1.bf16.msra.mxu1 %v3106_v14  ;;  %1955 = vmatprep.subr.bf16.mxu0 %v3111_v15  ;;  %v3151_v15 = vld [vmem:[#allocation8 + $0x2c0] ss:$16 sps:$4 sm:$0xff]  }
  0xa4   :  { %2119 = vmatprep.subr.bf16.mxu1 %v3114_v16  ;;  %v3154_v16 = vld [vmem:[#allocation8 + $0x2c8] ss:$16 sps:$4 sm:$0xff]  }
  0xa6   :  { %1956 = vmatpush1.bf16.msra.mxu0 %v3109_v17  ;;  %v3159_v17 = vld [vmem:[#allocation8 + $0x2e4] ss:$16 sps:$4 sm:$0xff]  }
  0xa7   :  { %2120 = vmatpush1.bf16.msra.mxu1 %v3112_v18  ;;  %1966 = vmatprep.subr.bf16.mxu0 %v3117_v19  ;;  %v3162_v18 = vld [vmem:[#allocation8 + $0x2ec] ss:$16 sps:$4 sm:$0xff]   ;;  %v3157_v19 = vld [vmem:[#allocation8 + $0x2e0] ss:$16 sps:$4 sm:$0xff]  }
  0xa8   :  { %2130 = vmatprep.subr.bf16.mxu1 %v3120_v20  ;;  %v3160_v20 = vld [vmem:[#allocation8 + $0x2e8] ss:$16 sps:$4 sm:$0xff]  }
 0x134   :  { %v221_v30 = vpop.f32.mrb[0].mxu0 }
 0x135   :  { %v222_v31 = vadd.f32 %v221_v30, %v101_v27  ;;  %v223_v32 = vpop.f32.mrb[1].mxu0  ;;  %v3723_v33 = vpop.f32.mrb[0].mxu1  ;;  %v3168_v27 = vld [vmem:[#allocation8 + $0x30c] ss:$16 sps:$4 sm:$0xff]   ;;  %v3171_v30 = vld [vmem:[#allocation8 + $0x324] ss:$16 sps:$4 sm:$0xff]  }
 0x136   :  { %v224_v34 = vadd.f32 %v223_v32, %v105_v28  ;;  %v225_v35 = vpop.f32.mrb[2].mxu0  ;;  %v264_v36 = vpop.f32.mrb[1].mxu1  ;;  %v3163_v28 = vld [vmem:[#allocation8 + $0x300] ss:$16 sps:$4 sm:$0xff]  }
 0x137   :  { %v351_v37 = vmax.f32 %v222_v31, 0.0  ;;  %v226_v38 = vpop.f32.mrb[3].mxu0  ;;  %v265_v39 = vadd.f32 %v264_v36, %v113_v29  ;;  %v266_v40 = vpop.f32.mrb[2].mxu1  ;;  %v3166_v29 = vld [vmem:[#allocation8 + $0x308] ss:$16 sps:$4 sm:$0xff]  }
 0x138   :  { %v352_v41 = vmax.f32 %v224_v34, 0.0  ;;  %v267_v42 = vpop.f32.mrb[3].mxu1  ;;  %v3174_v31 = vld [vmem:[#allocation8 + $0x32c] ss:$16 sps:$4 sm:$0xff]   ;;  %v3169_v32 = vld [vmem:[#allocation8 + $0x320] ss:$16 sps:$4 sm:$0xff]  }
 0x139   :  { %v354_v43 = vmax.f32 %v265_v39, 0.0  ;;  %v359_v47 = vpack.c.bf16 %v351_v37, %v351_v37  ;;  %v3172_v34 = vld [vmem:[#allocation8 + $0x328] ss:$16 sps:$4 sm:$0xff]   ;;  %v3177_v35 = vld [vmem:[#allocation8 + $0x344] ss:$16 sps:$4 sm:$0xff]  }
 0x13a   :  { %v360_v44 = vpack.c.bf16 %v352_v41, %v352_v41  ;;  %v3180_v36 = vld [vmem:[#allocation8 + $0x34c] ss:$16 sps:$4 sm:$0xff]   ;;  %v3175_v37 = vld [vmem:[#allocation8 + $0x340] ss:$16 sps:$4 sm:$0xff]   ;;  %v3178_v38 = vld [vmem:[#allocation8 + $0x348] ss:$16 sps:$4 sm:$0xff]  }
 0x13b   :  { %v362_v50 = vpack.c.bf16 %v354_v43, %v354_v43  ;;  %v3183_v39 = vld [vmem:[#allocation8 + $0x364] ss:$16 sps:$4 sm:$0xff]   ;;  %v3186_v40 = vld [vmem:[#allocation8 + $0x36c] ss:$16 sps:$4 sm:$0xff]   ;;  %v3181_v41 = vld [vmem:[#allocation8 + $0x360] ss:$16 sps:$4 sm:$0xff]  }
 0x13c   :  { %1957 = vmatprep.mubr.bf16.mxu0 %v360_v44  ;;  %2121 = vmatprep.mubr.bf16.mxu1 %v360_v44  ;;  %v3725_v51 = vpop.f32.mrb[4].mxu0  ;;  %v3184_v42 = vld [vmem:[#allocation8 + $0x368] ss:$16 sps:$4 sm:$0xff]   ;;  %v3189_v43 = vld [vmem:[#allocation8 + $0x384] ss:$16 sps:$4 sm:$0xff]  }
 0x13d   :  { %1958 = vmatmul.mubr.bf16.vlgmr.msra.gmra.mrb[8].mxu0 %v359_v47  ;;  %2122 = vmatmul.mubr.bf16.vlgmr.msra.gmra.mrb[8].mxu1 %v359_v47  ;;  %v3727_v52 = vpop.f32.mrb[5].mxu0  ;;  %v3729_v9 = vpop.f32.mrb[4].mxu1  ;;  %v3192_v44 = vld [vmem:[#allocation8 + $0x38c] ss:$16 sps:$4 sm:$0xff]   ;;  %v3190_v47 = vld [vmem:[#allocation8 + $0x388] ss:$16 sps:$4 sm:$0xff]  }
 0x13e   :  { %1967 = vmatpush1.bf16.msra.mxu0 %v3115_v45  ;;  %2131 = vmatpush1.bf16.msra.mxu1 %v3118_v46  ;;  %v307_v55 = vpop.f32.mrb[6].mxu0  ;;  %v3731_v12 = vpop.f32.mrb[5].mxu1  ;;  %v108_v45 = vsub.s32 2, %v3707_v22  ;;  %v3187_v46 = vld [vmem:[#allocation8 + $0x380] ss:$16 sps:$4 sm:$0xff]  }
 0x13f   :  { %1968 = vmatprep.subr.bf16.mxu0 %v3123_v48  ;;  %2132 = vmatprep.subr.bf16.mxu1 %v3126_v49  ;;  %v308_v58 = vpop.f32.mrb[7].mxu0  ;;  %v348_v13 = vpop.f32.mrb[6].mxu1  ;;  %v3195_v48 = vld [vmem:[#allocation8 + $0x3a4] ss:$16 sps:$4 sm:$0xff]   ;;  %v3198_v49 = vld [vmem:[#allocation8 + $0x3ac] ss:$16 sps:$4 sm:$0xff]  }
 0x140   :  { %1998 = vmatprep.mubr.bf16.mxu0 %v362_v50  ;;  %2162 = vmatprep.mubr.bf16.mxu1 %v362_v50  ;;  %v349_v14 = vpop.f32.mrb[7].mxu1  ;;  %v120_v50 = vsub.s32 5, %v3707_v22  ;;  %v3196_v55 = vld [vmem:[#allocation8 + $0x3a8] ss:$16 sps:$4 sm:$0xff]   ;;  %v3217_v13 = vld [vmem:[#allocation8 + $0x420] ss:$16 sps:$4 sm:$0xff]  }
 0x141   :  { %v3220_v14 = vld [vmem:[#allocation8 + $0x428] ss:$16 sps:$4 sm:$0xff]  }
 0x142   :  { %1969 = vmatpush1.bf16.msra.mxu0 %v3121_v53  ;;  %2133 = vmatpush1.bf16.msra.mxu1 %v3124_v54  ;;  %v109_v53 = vrot.slane %v3710_v24, %v108_v45  ;;  %v3193_v54 = vld [vmem:[#allocation8 + $0x3a0] ss:$16 sps:$4 sm:$0xff]   ;;  %v121_v58 = vrot.slane %v3710_v24, %v120_v50  ;;  %v3267_v50 = vld [vmem:[#allocation8 + $0x524] ss:$16 sps:$4 sm:$0xff]  }
 0x143   :  { %1970 = vmatprep.subr.bf16.mxu0 %v3129_v56  ;;  %2134 = vmatprep.subr.bf16.mxu1 %v3132_v57  ;;  %v3201_v56 = vld [vmem:[#allocation8 + $0x3c4] ss:$16 sps:$4 sm:$0xff]   ;;  %v3204_v57 = vld [vmem:[#allocation8 + $0x3cc] ss:$16 sps:$4 sm:$0xff]  }
 0x146   :  { %1971 = vmatpush1.bf16.msra.mxu0 %v3127_v59  ;;  %2135 = vmatpush1.bf16.msra.mxu1 %v3130_v60  ;;  %v263_v59 = vadd.f32 %v3723_v33, %v109_v53  ;;  %v3199_v60 = vld [vmem:[#allocation8 + $0x3c0] ss:$16 sps:$4 sm:$0xff]   ;;  %v3270_v53 = vld [vmem:[#allocation8 + $0x52c] ss:$16 sps:$4 sm:$0xff]  }
 0x147   :  { %1972 = vmatprep.subr.bf16.mxu0 %v3135_v61  ;;  %2136 = vmatprep.subr.bf16.mxu1 %v3138_v62  ;;  %v3202_v61 = vld [vmem:[#allocation8 + $0x3c8] ss:$16 sps:$4 sm:$0xff]   ;;  %v3207_v62 = vld [vmem:[#allocation8 + $0x3e4] ss:$16 sps:$4 sm:$0xff]  }
 0x14a   :  { %1973 = vmatpush1.bf16.msra.mxu0 %v3133_v63  ;;  %2137 = vmatpush1.bf16.msra.mxu1 %v3136_v0  ;;  %v3210_v63 = vld [vmem:[#allocation8 + $0x3ec] ss:$16 sps:$4 sm:$0xff]   ;;  %v306_v0 = vadd.f32 %v3727_v52, %v121_v58  ;;  %v3271_v58 = vld [vmem:[#allocation8 + $0x540] ss:$16 sps:$4 sm:$0xff]  }
 0x14b   :  { %1974 = vmatprep.subr.bf16.mxu0 %v3141_v1  ;;  %2138 = vmatprep.subr.bf16.mxu1 %v3144_v2  ;;  %v353_v1 = vmax.f32 %v263_v59, 0.0  ;;  %v3205_v2 = vld [vmem:[#allocation8 + $0x3e0] ss:$16 sps:$4 sm:$0xff]   ;;  %v3274_v59 = vld [vmem:[#allocation8 + $0x548] ss:$16 sps:$4 sm:$0xff]  }
 0x14c   :  { %v356_v33 = vmax.f32 %v306_v0, 0.0  ;;  %v3285_v0 = vld [vmem:[#allocation8 + $0x584] ss:$16 sps:$4 sm:$0xff]  }
 0x14e   :  { %1975 = vmatpush1.bf16.msra.mxu0 %v3139_v3  ;;  %2139 = vmatpush1.bf16.msra.mxu1 %v3142_v4  ;;  %v3208_v3 = vld [vmem:[#allocation8 + $0x3e8] ss:$16 sps:$4 sm:$0xff]   ;;  %v3213_v4 = vld [vmem:[#allocation8 + $0x404] ss:$16 sps:$4 sm:$0xff]   ;;  %v364_v52 = vpack.c.bf16 %v356_v33, %v356_v33  ;;  %v3294_v33 = vld [vmem:[#allocation8 + $0x5ac] ss:$16 sps:$4 sm:$0xff]  }
 0x14f   :  { %1976 = vmatprep.subr.bf16.mxu0 %v3147_v5  ;;  %2140 = vmatprep.subr.bf16.mxu1 %v3150_v6  ;;  %v3216_v5 = vld [vmem:[#allocation8 + $0x40c] ss:$16 sps:$4 sm:$0xff]   ;;  %v361_v6 = vpack.c.bf16 %v353_v1, %v353_v1 }
 0x150   :  { %v3288_v1 = vld [vmem:[#allocation8 + $0x58c] ss:$16 sps:$4 sm:$0xff]  }
 0x152   :  { %1977 = vmatpush1.bf16.msra.mxu0 %v3145_v7  ;;  %2141 = vmatpush1.bf16.msra.mxu1 %v3148_v8  ;;  %v3211_v7 = vld [vmem:[#allocation8 + $0x400] ss:$16 sps:$4 sm:$0xff]   ;;  %v3214_v8 = vld [vmem:[#allocation8 + $0x408] ss:$16 sps:$4 sm:$0xff]  }
 0x153   :  { %1978 = vmatprep.subr.bf16.mxu0 %v3153_v10  ;;  %2142 = vmatprep.subr.bf16.mxu1 %v3156_v11  ;;  %v3219_v10 = vld [vmem:[#allocation8 + $0x424] ss:$16 sps:$4 sm:$0xff]   ;;  %v3222_v11 = vld [vmem:[#allocation8 + $0x42c] ss:$16 sps:$4 sm:$0xff]  }
 0x156   :  { %1979 = vmatpush1.bf16.msra.mxu0 %v3151_v15  ;;  %2143 = vmatpush1.bf16.msra.mxu1 %v3154_v16  ;;  %v3225_v15 = vld [vmem:[#allocation8 + $0x444] ss:$16 sps:$4 sm:$0xff]   ;;  %v3228_v16 = vld [vmem:[#allocation8 + $0x44c] ss:$16 sps:$4 sm:$0xff]  }
 0x157   :  { %1980 = vmatprep.subr.bf16.mxu0 %v3159_v17  ;;  %2144 = vmatprep.subr.bf16.mxu1 %v3162_v18  ;;  %v3223_v17 = vld [vmem:[#allocation8 + $0x440] ss:$16 sps:$4 sm:$0xff]   ;;  %v3226_v18 = vld [vmem:[#allocation8 + $0x448] ss:$16 sps:$4 sm:$0xff]  }
 0x15a   :  { %1981 = vmatpush1.bf16.msra.mxu0 %v3157_v19  ;;  %2145 = vmatpush1.bf16.msra.mxu1 %v3160_v20  ;;  %v3231_v19 = vld [vmem:[#allocation8 + $0x464] ss:$16 sps:$4 sm:$0xff]   ;;  %v3234_v20 = vld [vmem:[#allocation8 + $0x46c] ss:$16 sps:$4 sm:$0xff]  }
 0x15b   :  { %1982 = vmatprep.subr.bf16.mxu0 %v3165_v21  ;;  %2146 = vmatprep.subr.bf16.mxu1 %v3168_v27  ;;  %v3229_v21 = vld [vmem:[#allocation8 + $0x460] ss:$16 sps:$4 sm:$0xff]   ;;  %v3232_v27 = vld [vmem:[#allocation8 + $0x468] ss:$16 sps:$4 sm:$0xff]  }
 0x15e   :  { %1983 = vmatpush1.bf16.msra.mxu0 %v3163_v28  ;;  %2147 = vmatpush1.bf16.msra.mxu1 %v3166_v29  ;;  %v3237_v28 = vld [vmem:[#allocation8 + $0x484] ss:$16 sps:$4 sm:$0xff]   ;;  %v3240_v29 = vld [vmem:[#allocation8 + $0x48c] ss:$16 sps:$4 sm:$0xff]  }
 0x15f   :  { %1984 = vmatprep.subr.bf16.mxu0 %v3171_v30  ;;  %2148 = vmatprep.subr.bf16.mxu1 %v3174_v31  ;;  %v3235_v30 = vld [vmem:[#allocation8 + $0x480] ss:$16 sps:$4 sm:$0xff]   ;;  %v3238_v31 = vld [vmem:[#allocation8 + $0x488] ss:$16 sps:$4 sm:$0xff]  }
 0x162   :  { %1985 = vmatpush1.bf16.msra.mxu0 %v3169_v32  ;;  %2149 = vmatpush1.bf16.msra.mxu1 %v3172_v34  ;;  %v3243_v32 = vld [vmem:[#allocation8 + $0x4a4] ss:$16 sps:$4 sm:$0xff]   ;;  %v3246_v34 = vld [vmem:[#allocation8 + $0x4ac] ss:$16 sps:$4 sm:$0xff]  }
 0x163   :  { %1986 = vmatprep.subr.bf16.mxu0 %v3177_v35  ;;  %2150 = vmatprep.subr.bf16.mxu1 %v3180_v36  ;;  %v3241_v35 = vld [vmem:[#allocation8 + $0x4a0] ss:$16 sps:$4 sm:$0xff]   ;;  %v3244_v36 = vld [vmem:[#allocation8 + $0x4a8] ss:$16 sps:$4 sm:$0xff]  }
 0x166   :  { %1987 = vmatpush1.bf16.msra.mxu0 %v3175_v37  ;;  %2151 = vmatpush1.bf16.msra.mxu1 %v3178_v38  ;;  %v3249_v37 = vld [vmem:[#allocation8 + $0x4c4] ss:$16 sps:$4 sm:$0xff]   ;;  %v3252_v38 = vld [vmem:[#allocation8 + $0x4cc] ss:$16 sps:$4 sm:$0xff]  }
 0x167   :  { %1988 = vmatprep.subr.bf16.mxu0 %v3183_v39  ;;  %2152 = vmatprep.subr.bf16.mxu1 %v3186_v40  ;;  %v3247_v39 = vld [vmem:[#allocation8 + $0x4c0] ss:$16 sps:$4 sm:$0xff]   ;;  %v3250_v40 = vld [vmem:[#allocation8 + $0x4c8] ss:$16 sps:$4 sm:$0xff]  }
 0x16a   :  { %1989 = vmatpush1.bf16.msra.mxu0 %v3181_v41  ;;  %2153 = vmatpush1.bf16.msra.mxu1 %v3184_v42  ;;  %v3255_v41 = vld [vmem:[#allocation8 + $0x4e4] ss:$16 sps:$4 sm:$0xff]   ;;  %v3258_v42 = vld [vmem:[#allocation8 + $0x4ec] ss:$16 sps:$4 sm:$0xff]  }
 0x16b   :  { %1990 = vmatprep.subr.bf16.mxu0 %v3189_v43  ;;  %2154 = vmatprep.subr.bf16.mxu1 %v3192_v44  ;;  %v3253_v43 = vld [vmem:[#allocation8 + $0x4e0] ss:$16 sps:$4 sm:$0xff]   ;;  %v3256_v44 = vld [vmem:[#allocation8 + $0x4e8] ss:$16 sps:$4 sm:$0xff]  }
 0x16e   :  { %1991 = vmatpush1.bf16.msra.mxu0 %v3187_v46  ;;  %2155 = vmatpush1.bf16.msra.mxu1 %v3190_v47  ;;  %v3261_v46 = vld [vmem:[#allocation8 + $0x504] ss:$16 sps:$4 sm:$0xff]   ;;  %v3264_v47 = vld [vmem:[#allocation8 + $0x50c] ss:$16 sps:$4 sm:$0xff]  }
 0x16f   :  { %1992 = vmatprep.subr.bf16.mxu0 %v3195_v48  ;;  %2156 = vmatprep.subr.bf16.mxu1 %v3198_v49  ;;  %v3259_v48 = vld [vmem:[#allocation8 + $0x500] ss:$16 sps:$4 sm:$0xff]   ;;  %v3262_v49 = vld [vmem:[#allocation8 + $0x508] ss:$16 sps:$4 sm:$0xff]  }
 0x172   :  { %1993 = vmatpush1.bf16.msra.mxu0 %v3193_v54  ;;  %2157 = vmatpush1.bf16.msra.mxu1 %v3196_v55  ;;  %v3265_v54 = vld [vmem:[#allocation8 + $0x520] ss:$16 sps:$4 sm:$0xff]   ;;  %v3268_v55 = vld [vmem:[#allocation8 + $0x528] ss:$16 sps:$4 sm:$0xff]  }
 0x173   :  { %1994 = vmatprep.subr.bf16.mxu0 %v3201_v56  ;;  %2158 = vmatprep.subr.bf16.mxu1 %v3204_v57  ;;  %v3273_v56 = vld [vmem:[#allocation8 + $0x544] ss:$16 sps:$4 sm:$0xff]   ;;  %v3276_v57 = vld [vmem:[#allocation8 + $0x54c] ss:$16 sps:$4 sm:$0xff]  }
 0x176   :  { %1995 = vmatpush1.bf16.msra.mxu0 %v3199_v60  ;;  %2159 = vmatpush1.bf16.msra.mxu1 %v3202_v61  ;;  %v3279_v60 = vld [vmem:[#allocation8 + $0x564] ss:$16 sps:$4 sm:$0xff]   ;;  %v3282_v61 = vld [vmem:[#allocation8 + $0x56c] ss:$16 sps:$4 sm:$0xff]  }
 0x177   :  { %1996 = vmatprep.subr.bf16.mxu0 %v3207_v62  ;;  %2160 = vmatprep.subr.bf16.mxu1 %v3210_v63  ;;  %v3277_v62 = vld [vmem:[#allocation8 + $0x560] ss:$16 sps:$4 sm:$0xff]   ;;  %v3280_v63 = vld [vmem:[#allocation8 + $0x568] ss:$16 sps:$4 sm:$0xff]  }
 0x17a   :  { %1997 = vmatpush1.bf16.msra.mxu0 %v3205_v2  ;;  %2161 = vmatpush1.bf16.msra.mxu1 %v3208_v3  ;;  %v116_v2 = vsub.s32 4, %v3707_v22  ;;  %v3283_v3 = vld [vmem:[#allocation8 + $0x580] ss:$16 sps:$4 sm:$0xff]  }
 0x17b   :  { %2007 = vmatprep.subr.bf16.mxu0 %v3213_v4  ;;  %2171 = vmatprep.subr.bf16.mxu1 %v3216_v5  ;;  %v3286_v4 = vld [vmem:[#allocation8 + $0x588] ss:$16 sps:$4 sm:$0xff]   ;;  %v3291_v5 = vld [vmem:[#allocation8 + $0x5a4] ss:$16 sps:$4 sm:$0xff]  }
 0x17d   :  { %1999 = vmatmul.mubr.bf16.vlgmr.msra.gmra.mrb[8].mxu0 %v361_v6  ;;  %2163 = vmatmul.mubr.bf16.vlgmr.msra.gmra.mrb[8].mxu1 %v361_v6  ;;  %v128_v6 = vsub.s32 7, %v3707_v22 }
 0x17e   :  { %2008 = vmatpush1.bf16.msra.mxu0 %v3211_v7  ;;  %2172 = vmatpush1.bf16.msra.mxu1 %v3214_v8  ;;  %v117_v7 = vrot.slane %v3710_v24, %v116_v2  ;;  %v3289_v8 = vld [vmem:[#allocation8 + $0x5a0] ss:$16 sps:$4 sm:$0xff]   ;;  %v3360_v2 = vld [vmem:[#allocation8 + $0x70c] ss:$16 sps:$4 sm:$0xff]  }
 0x17f   :  { %2009 = vmatprep.subr.bf16.mxu0 %v3219_v10  ;;  %2173 = vmatprep.subr.bf16.mxu1 %v3222_v11  ;;  %v3292_v10 = vld [vmem:[#allocation8 + $0x5a8] ss:$16 sps:$4 sm:$0xff]   ;;  %v3297_v11 = vld [vmem:[#allocation8 + $0x5c4] ss:$16 sps:$4 sm:$0xff]  }
 0x180   :  { %2039 = vmatprep.mubr.bf16.mxu0 %v364_v52  ;;  %2203 = vmatprep.mubr.bf16.mxu1 %v364_v52  ;;  %v3300_v52 = vld [vmem:[#allocation8 + $0x5cc] ss:$16 sps:$4 sm:$0xff]  }
 0x182   :  { %2010 = vmatpush1.bf16.msra.mxu0 %v3217_v13  ;;  %2174 = vmatpush1.bf16.msra.mxu1 %v3220_v14  ;;  %v129_v13 = vrot.slane %v3710_v24, %v128_v6  ;;  %v304_v14 = vadd.f32 %v3725_v51, %v117_v7  ;;  %v3361_v6 = vld [vmem:[#allocation8 + $0x720] ss:$16 sps:$4 sm:$0xff]   ;;  %v3364_v7 = vld [vmem:[#allocation8 + $0x728] ss:$16 sps:$4 sm:$0xff]  }
 0x183   :  { %2011 = vmatprep.subr.bf16.mxu0 %v3225_v15  ;;  %2175 = vmatprep.subr.bf16.mxu1 %v3228_v16  ;;  %v3295_v15 = vld [vmem:[#allocation8 + $0x5c0] ss:$16 sps:$4 sm:$0xff]   ;;  %v3298_v16 = vld [vmem:[#allocation8 + $0x5c8] ss:$16 sps:$4 sm:$0xff]  }
 0x186   :  { %2012 = vmatpush1.bf16.msra.mxu0 %v3223_v17  ;;  %2176 = vmatpush1.bf16.msra.mxu1 %v3226_v18  ;;  %v3303_v17 = vld [vmem:[#allocation8 + $0x5e4] ss:$16 sps:$4 sm:$0xff]   ;;  %v3306_v18 = vld [vmem:[#allocation8 + $0x5ec] ss:$16 sps:$4 sm:$0xff]  }
 0x187   :  { %2013 = vmatprep.subr.bf16.mxu0 %v3231_v19  ;;  %2177 = vmatprep.subr.bf16.mxu1 %v3234_v20  ;;  %v347_v19 = vadd.f32 %v3731_v12, %v129_v13  ;;  %v355_v20 = vmax.f32 %v304_v14, 0.0  ;;  %v3375_v13 = vld [vmem:[#allocation8 + $0x764] ss:$16 sps:$4 sm:$0xff]   ;;  %v3378_v14 = vld [vmem:[#allocation8 + $0x76c] ss:$16 sps:$4 sm:$0xff]  }
 0x189   :  { %v358_v51 = vmax.f32 %v347_v19, 0.0  ;;  %v3379_v19 = vld [vmem:[#allocation8 + $0x780] ss:$16 sps:$4 sm:$0xff]  }
 0x18a   :  { %2014 = vmatpush1.bf16.msra.mxu0 %v3229_v21  ;;  %2178 = vmatpush1.bf16.msra.mxu1 %v3232_v27  ;;  %v3301_v21 = vld [vmem:[#allocation8 + $0x5e0] ss:$16 sps:$4 sm:$0xff]   ;;  %v3304_v27 = vld [vmem:[#allocation8 + $0x5e8] ss:$16 sps:$4 sm:$0xff]  }
 0x18b   :  { %2015 = vmatprep.subr.bf16.mxu0 %v3237_v28  ;;  %2179 = vmatprep.subr.bf16.mxu1 %v3240_v29  ;;  %v3309_v28 = vld [vmem:[#allocation8 + $0x604] ss:$16 sps:$4 sm:$0xff]   ;;  %v3312_v29 = vld [vmem:[#allocation8 + $0x60c] ss:$16 sps:$4 sm:$0xff]   ;;  %v366_v12 = vpack.c.bf16 %v358_v51, %v358_v51  ;;  %v3388_v51 = vld [vmem:[#allocation8 + $0x7a8] ss:$16 sps:$4 sm:$0xff]  }
 0x18e   :  { %2016 = vmatpush1.bf16.msra.mxu0 %v3235_v30  ;;  %2180 = vmatpush1.bf16.msra.mxu1 %v3238_v31  ;;  %v363_v30 = vpack.c.bf16 %v355_v20, %v355_v20  ;;  %v3307_v31 = vld [vmem:[#allocation8 + $0x600] ss:$16 sps:$4 sm:$0xff]   ;;  %v3382_v20 = vld [vmem:[#allocation8 + $0x788] ss:$16 sps:$4 sm:$0xff]  }
 0x18f   :  { %2017 = vmatprep.subr.bf16.mxu0 %v3243_v32  ;;  %2181 = vmatprep.subr.bf16.mxu1 %v3246_v34  ;;  %v3310_v32 = vld [vmem:[#allocation8 + $0x608] ss:$16 sps:$4 sm:$0xff]   ;;  %v3315_v34 = vld [vmem:[#allocation8 + $0x624] ss:$16 sps:$4 sm:$0xff]  }
 0x192   :  { %2018 = vmatpush1.bf16.msra.mxu0 %v3241_v35  ;;  %2182 = vmatpush1.bf16.msra.mxu1 %v3244_v36  ;;  %v3318_v35 = vld [vmem:[#allocation8 + $0x62c] ss:$16 sps:$4 sm:$0xff]   ;;  %v3313_v36 = vld [vmem:[#allocation8 + $0x620] ss:$16 sps:$4 sm:$0xff]  }
 0x193   :  { %2019 = vmatprep.subr.bf16.mxu0 %v3249_v37  ;;  %2183 = vmatprep.subr.bf16.mxu1 %v3252_v38  ;;  %v3316_v37 = vld [vmem:[#allocation8 + $0x628] ss:$16 sps:$4 sm:$0xff]   ;;  %v3321_v38 = vld [vmem:[#allocation8 + $0x644] ss:$16 sps:$4 sm:$0xff]  }
 0x196   :  { %2020 = vmatpush1.bf16.msra.mxu0 %v3247_v39  ;;  %2184 = vmatpush1.bf16.msra.mxu1 %v3250_v40  ;;  %v3324_v39 = vld [vmem:[#allocation8 + $0x64c] ss:$16 sps:$4 sm:$0xff]   ;;  %v3319_v40 = vld [vmem:[#allocation8 + $0x640] ss:$16 sps:$4 sm:$0xff]  }
 0x197   :  { %2021 = vmatprep.subr.bf16.mxu0 %v3255_v41  ;;  %2185 = vmatprep.subr.bf16.mxu1 %v3258_v42  ;;  %v3322_v41 = vld [vmem:[#allocation8 + $0x648] ss:$16 sps:$4 sm:$0xff]   ;;  %v3327_v42 = vld [vmem:[#allocation8 + $0x664] ss:$16 sps:$4 sm:$0xff]  }
 0x19a   :  { %2022 = vmatpush1.bf16.msra.mxu0 %v3253_v43  ;;  %2186 = vmatpush1.bf16.msra.mxu1 %v3256_v44  ;;  %v3330_v43 = vld [vmem:[#allocation8 + $0x66c] ss:$16 sps:$4 sm:$0xff]   ;;  %v3325_v44 = vld [vmem:[#allocation8 + $0x660] ss:$16 sps:$4 sm:$0xff]  }
 0x19b   :  { %2023 = vmatprep.subr.bf16.mxu0 %v3261_v46  ;;  %2187 = vmatprep.subr.bf16.mxu1 %v3264_v47  ;;  %v3328_v46 = vld [vmem:[#allocation8 + $0x668] ss:$16 sps:$4 sm:$0xff]   ;;  %v3333_v47 = vld [vmem:[#allocation8 + $0x684] ss:$16 sps:$4 sm:$0xff]  }
 0x19e   :  { %2024 = vmatpush1.bf16.msra.mxu0 %v3259_v48  ;;  %2188 = vmatpush1.bf16.msra.mxu1 %v3262_v49  ;;  %v3336_v48 = vld [vmem:[#allocation8 + $0x68c] ss:$16 sps:$4 sm:$0xff]   ;;  %v3331_v49 = vld [vmem:[#allocation8 + $0x680] ss:$16 sps:$4 sm:$0xff]  }
 0x19f   :  { %2025 = vmatprep.subr.bf16.mxu0 %v3267_v50  ;;  %2189 = vmatprep.subr.bf16.mxu1 %v3270_v53  ;;  %v3334_v50 = vld [vmem:[#allocation8 + $0x688] ss:$16 sps:$4 sm:$0xff]   ;;  %v3339_v53 = vld [vmem:[#allocation8 + $0x6a4] ss:$16 sps:$4 sm:$0xff]  }
 0x1a2   :  { %2026 = vmatpush1.bf16.msra.mxu0 %v3265_v54  ;;  %2190 = vmatpush1.bf16.msra.mxu1 %v3268_v55  ;;  %v3342_v54 = vld [vmem:[#allocation8 + $0x6ac] ss:$16 sps:$4 sm:$0xff]   ;;  %v3337_v55 = vld [vmem:[#allocation8 + $0x6a0] ss:$16 sps:$4 sm:$0xff]  }
 0x1a3   :  { %2027 = vmatprep.subr.bf16.mxu0 %v3273_v56  ;;  %2191 = vmatprep.subr.bf16.mxu1 %v3276_v57  ;;  %v3340_v56 = vld [vmem:[#allocation8 + $0x6a8] ss:$16 sps:$4 sm:$0xff]   ;;  %v3345_v57 = vld [vmem:[#allocation8 + $0x6c4] ss:$16 sps:$4 sm:$0xff]  }
 0x1a6   :  { %2028 = vmatpush1.bf16.msra.mxu0 %v3271_v58  ;;  %2192 = vmatpush1.bf16.msra.mxu1 %v3274_v59  ;;  %v3348_v58 = vld [vmem:[#allocation8 + $0x6cc] ss:$16 sps:$4 sm:$0xff]   ;;  %v3343_v59 = vld [vmem:[#allocation8 + $0x6c0] ss:$16 sps:$4 sm:$0xff]  }
 0x1a7   :  { %2029 = vmatprep.subr.bf16.mxu0 %v3279_v60  ;;  %2193 = vmatprep.subr.bf16.mxu1 %v3282_v61  ;;  %v3346_v60 = vld [vmem:[#allocation8 + $0x6c8] ss:$16 sps:$4 sm:$0xff]   ;;  %v3351_v61 = vld [vmem:[#allocation8 + $0x6e4] ss:$16 sps:$4 sm:$0xff]  }
 0x1aa   :  { %2030 = vmatpush1.bf16.msra.mxu0 %v3277_v62  ;;  %2194 = vmatpush1.bf16.msra.mxu1 %v3280_v63  ;;  %v3354_v62 = vld [vmem:[#allocation8 + $0x6ec] ss:$16 sps:$4 sm:$0xff]   ;;  %v3349_v63 = vld [vmem:[#allocation8 + $0x6e0] ss:$16 sps:$4 sm:$0xff]  }
 0x1ab   :  { %2031 = vmatprep.subr.bf16.mxu0 %v3285_v0  ;;  %2195 = vmatprep.subr.bf16.mxu1 %v3288_v1  ;;  %v3352_v0 = vld [vmem:[#allocation8 + $0x6e8] ss:$16 sps:$4 sm:$0xff]   ;;  %v3357_v1 = vld [vmem:[#allocation8 + $0x704] ss:$16 sps:$4 sm:$0xff]  }
 0x1ae   :  { %2032 = vmatpush1.bf16.msra.mxu0 %v3283_v3  ;;  %2196 = vmatpush1.bf16.msra.mxu1 %v3286_v4  ;;  %v3355_v3 = vld [vmem:[#allocation8 + $0x700] ss:$16 sps:$4 sm:$0xff]   ;;  %v3358_v4 = vld [vmem:[#allocation8 + $0x708] ss:$16 sps:$4 sm:$0xff]  }
 0x1af   :  { %2033 = vmatprep.subr.bf16.mxu0 %v3291_v5  ;;  %2197 = vmatprep.subr.bf16.mxu1 %v3294_v33  ;;  %v3363_v5 = vld [vmem:[#allocation8 + $0x724] ss:$16 sps:$4 sm:$0xff]   ;;  %v3366_v33 = vld [vmem:[#allocation8 + $0x72c] ss:$16 sps:$4 sm:$0xff]  }
 0x1b2   :  { %2034 = vmatpush1.bf16.msra.mxu0 %v3289_v8  ;;  %2198 = vmatpush1.bf16.msra.mxu1 %v3292_v10  ;;  %v3369_v8 = vld [vmem:[#allocation8 + $0x744] ss:$16 sps:$4 sm:$0xff]   ;;  %v3372_v10 = vld [vmem:[#allocation8 + $0x74c] ss:$16 sps:$4 sm:$0xff]  }
 0x1b3   :  { %2035 = vmatprep.subr.bf16.mxu0 %v3297_v11  ;;  %2199 = vmatprep.subr.bf16.mxu1 %v3300_v52  ;;  %v3367_v11 = vld [vmem:[#allocation8 + $0x740] ss:$16 sps:$4 sm:$0xff]   ;;  %v3370_v52 = vld [vmem:[#allocation8 + $0x748] ss:$16 sps:$4 sm:$0xff]  }
 0x1b6   :  { %2036 = vmatpush1.bf16.msra.mxu0 %v3295_v15  ;;  %2200 = vmatpush1.bf16.msra.mxu1 %v3298_v16  ;;  %v3373_v15 = vld [vmem:[#allocation8 + $0x760] ss:$16 sps:$4 sm:$0xff]   ;;  %v3376_v16 = vld [vmem:[#allocation8 + $0x768] ss:$16 sps:$4 sm:$0xff]  }
 0x1b7   :  { %2037 = vmatprep.subr.bf16.mxu0 %v3303_v17  ;;  %2201 = vmatprep.subr.bf16.mxu1 %v3306_v18  ;;  %v3381_v17 = vld [vmem:[#allocation8 + $0x784] ss:$16 sps:$4 sm:$0xff]   ;;  %v3384_v18 = vld [vmem:[#allocation8 + $0x78c] ss:$16 sps:$4 sm:$0xff]  }
 0x1ba   :  { %2038 = vmatpush1.bf16.msra.mxu0 %v3301_v21  ;;  %2202 = vmatpush1.bf16.msra.mxu1 %v3304_v27  ;;  %v124_v21 = vsub.s32 6, %v3707_v22  ;;  %v3387_v27 = vld [vmem:[#allocation8 + $0x7a4] ss:$16 sps:$4 sm:$0xff]  }
 0x1bb   :  { %2048 = vmatprep.subr.bf16.mxu0 %v3309_v28  ;;  %2212 = vmatprep.subr.bf16.mxu1 %v3312_v29  ;;  %v3390_v28 = vld [vmem:[#allocation8 + $0x7ac] ss:$16 sps:$4 sm:$0xff]   ;;  %v3385_v29 = vld [vmem:[#allocation8 + $0x7a0] ss:$16 sps:$4 sm:$0xff]  }
 0x1bd   :  { %2040 = vmatmul.mubr.bf16.vlgmr.msra.gmra.mrb[8].mxu0 %v363_v30  ;;  %2204 = vmatmul.mubr.bf16.vlgmr.msra.gmra.mrb[8].mxu1 %v363_v30  ;;  %v125_v30 = vrot.slane %v3710_v24, %v124_v21  ;;  %v3403_v24 = vld [vmem:[#allocation10 + $0x40] sm:$0xff]  }
 0x1be   :  { %2049 = vmatpush1.bf16.msra.mxu0 %v3307_v31  ;;  %2213 = vmatpush1.bf16.msra.mxu1 %v3310_v32  ;;  %v3393_v31 = vld [vmem:[#allocation8 + $0x7c4] ss:$16 sps:$4 sm:$0xff]   ;;  %v3396_v32 = vld [vmem:[#allocation8 + $0x7cc] ss:$16 sps:$4 sm:$0xff]  }
 0x1bf   :  { %2050 = vmatprep.subr.bf16.mxu0 %v3315_v34  ;;  %2214 = vmatprep.subr.bf16.mxu1 %v3318_v35  ;;  %v3391_v34 = vld [vmem:[#allocation8 + $0x7c0] ss:$16 sps:$4 sm:$0xff]   ;;  %v3394_v35 = vld [vmem:[#allocation8 + $0x7c8] ss:$16 sps:$4 sm:$0xff]  }
 0x1c0   :  { %2080 = vmatprep.mubr.bf16.mxu0 %v366_v12  ;;  %2244 = vmatprep.mubr.bf16.mxu1 %v366_v12  ;;  %v345_v12 = vadd.f32 %v3729_v9, %v125_v30  ;;  %v3407_v9 = vld [vmem:[#allocation10 + $0x48] sm:$0xff]  }
 0x1c2   :  { %2051 = vmatpush1.bf16.msra.mxu0 %v3313_v36  ;;  %2215 = vmatpush1.bf16.msra.mxu1 %v3316_v37  ;;  %v3399_v36 = vld [vmem:[#allocation8 + $0x7e4] ss:$16 sps:$4 sm:$0xff]   ;;  %v3402_v37 = vld [vmem:[#allocation8 + $0x7ec] ss:$16 sps:$4 sm:$0xff]  }
 0x1c3   :  { %2052 = vmatprep.subr.bf16.mxu0 %v3321_v38  ;;  %2216 = vmatprep.subr.bf16.mxu1 %v3324_v39  ;;  %v3397_v38 = vld [vmem:[#allocation8 + $0x7e0] ss:$16 sps:$4 sm:$0xff]   ;;  %v3400_v39 = vld [vmem:[#allocation8 + $0x7e8] ss:$16 sps:$4 sm:$0xff]  }
 0x1c6   :  { %2053 = vmatpush1.bf16.msra.mxu0 %v3319_v40  ;;  %2217 = vmatpush1.bf16.msra.mxu1 %v3322_v41  ;;  %v357_v40 = vmax.f32 %v345_v12, 0.0  ;;  %v3404_v41 = vld [vmem:[#allocation10 + $0xc0] sm:$0xff]  }
 0x1c7   :  { %2054 = vmatprep.subr.bf16.mxu0 %v3327_v42  ;;  %2218 = vmatprep.subr.bf16.mxu1 %v3330_v43  ;;  %v3405_v42 = vld [vmem:[#allocation10] sm:$0xff]  }
 0x1c8   :  { %v3406_v43 = vld [vmem:[#allocation10 + $0x80] sm:$0xff]  }
 0x1ca   :  { %2055 = vmatpush1.bf16.msra.mxu0 %v3325_v44  ;;  %2219 = vmatpush1.bf16.msra.mxu1 %v3328_v46  ;;  %v365_v44 = vpack.c.bf16 %v357_v40, %v357_v40  ;;  %v3408_v46 = vld [vmem:[#allocation10 + $0xc8] sm:$0xff]  }
 0x1cb   :  { %2056 = vmatprep.subr.bf16.mxu0 %v3333_v47  ;;  %2220 = vmatprep.subr.bf16.mxu1 %v3336_v48  ;;  %v3409_v47 = vld [vmem:[#allocation10 + $0x8] sm:$0xff]  }
 0x1cc   :  { %v3410_v48 = vld [vmem:[#allocation10 + $0x88] sm:$0xff]  }
 0x1ce   :  { %2057 = vmatpush1.bf16.msra.mxu0 %v3331_v49  ;;  %2221 = vmatpush1.bf16.msra.mxu1 %v3334_v50  ;;  %v3411_v49 = vld [vmem:[#allocation10 + $0x50] sm:$0xff]  }
 0x1cf   :  { %2058 = vmatprep.subr.bf16.mxu0 %v3339_v53  ;;  %2222 = vmatprep.subr.bf16.mxu1 %v3342_v54  ;;  %v3412_v50 = vld [vmem:[#allocation10 + $0xd0] sm:$0xff]  }
 0x1d0   :  { %v3413_v53 = vld [vmem:[#allocation10 + $0x10] sm:$0xff]  }
 0x1d1   :  { %v3414_v54 = vld [vmem:[#allocation10 + $0x90] sm:$0xff]  }
 0x1d2   :  { %2059 = vmatpush1.bf16.msra.mxu0 %v3337_v55  ;;  %2223 = vmatpush1.bf16.msra.mxu1 %v3340_v56  ;;  %v3415_v55 = vld [vmem:[#allocation10 + $0x58] sm:$0xff]  }
 0x1d3   :  { %2060 = vmatprep.subr.bf16.mxu0 %v3345_v57  ;;  %2224 = vmatprep.subr.bf16.mxu1 %v3348_v58  ;;  %v3416_v56 = vld [vmem:[#allocation10 + $0xd8] sm:$0xff]  }
 0x1d4   :  { %v3417_v57 = vld [vmem:[#allocation10 + $0x18] sm:$0xff]  }
 0x1d5   :  { %v3418_v58 = vld [vmem:[#allocation10 + $0x98] sm:$0xff]  }
 0x1d6   :  { %2061 = vmatpush1.bf16.msra.mxu0 %v3343_v59  ;;  %2225 = vmatpush1.bf16.msra.mxu1 %v3346_v60  ;;  %v3419_v59 = vld [vmem:[#allocation10 + $0x60] sm:$0xff]  }
 0x1d7   :  { %2062 = vmatprep.subr.bf16.mxu0 %v3351_v61  ;;  %2226 = vmatprep.subr.bf16.mxu1 %v3354_v62  ;;  %v3420_v60 = vld [vmem:[#allocation10 + $0xe0] sm:$0xff]  }
 0x1d8   :  { %v3421_v61 = vld [vmem:[#allocation10 + $0x20] sm:$0xff]  }
 0x1d9   :  { %v3422_v62 = vld [vmem:[#allocation10 + $0xa0] sm:$0xff]  }
 0x1da   :  { %2063 = vmatpush1.bf16.msra.mxu0 %v3349_v63  ;;  %2227 = vmatpush1.bf16.msra.mxu1 %v3352_v0  ;;  %v3423_v63 = vld [vmem:[#allocation10 + $0x68] sm:$0xff]  }
 0x1db   :  { %2064 = vmatprep.subr.bf16.mxu0 %v3357_v1  ;;  %2228 = vmatprep.subr.bf16.mxu1 %v3360_v2  ;;  %v3424_v0 = vld [vmem:[#allocation10 + $0xe8] sm:$0xff]  }
 0x1dc   :  { %v3425_v1 = vld [vmem:[#allocation10 + $0x28] sm:$0xff]  }
 0x1dd   :  { %v3426_v2 = vld [vmem:[#allocation10 + $0xa8] sm:$0xff]  }
 0x1de   :  { %2065 = vmatpush1.bf16.msra.mxu0 %v3355_v3  ;;  %2229 = vmatpush1.bf16.msra.mxu1 %v3358_v4  ;;  %v3427_v3 = vld [vmem:[#allocation10 + $0x70] sm:$0xff]  }
 0x1df   :  { %2066 = vmatprep.subr.bf16.mxu0 %v3363_v5  ;;  %2230 = vmatprep.subr.bf16.mxu1 %v3366_v33  ;;  %v3428_v4 = vld [vmem:[#allocation10 + $0xf0] sm:$0xff]  }
 0x1e0   :  { %v3429_v5 = vld [vmem:[#allocation10 + $0x30] sm:$0xff]  }
 0x1e1   :  { %v3430_v33 = vld [vmem:[#allocation10 + $0xb0] sm:$0xff]  }
 0x1e2   :  { %2067 = vmatpush1.bf16.msra.mxu0 %v3361_v6  ;;  %2231 = vmatpush1.bf16.msra.mxu1 %v3364_v7  ;;  %v3431_v6 = vld [vmem:[#allocation10 + $0x78] sm:$0xff]  }
 0x1e3   :  { %2068 = vmatprep.subr.bf16.mxu0 %v3369_v8  ;;  %2232 = vmatprep.subr.bf16.mxu1 %v3372_v10  ;;  %v3432_v7 = vld [vmem:[#allocation10 + $0xf8] sm:$0xff]  }
 0x1e4   :  { %v3433_v8 = vld [vmem:[#allocation10 + $0x38] sm:$0xff]  }
 0x1e5   :  { %v3434_v10 = vld [vmem:[#allocation10 + $0xb8] sm:$0xff]  }
 0x1e6   :  { %2069 = vmatpush1.bf16.msra.mxu0 %v3367_v11  ;;  %2233 = vmatpush1.bf16.msra.mxu1 %v3370_v52  ;;  %v623_v11 = vld [vmem:[%s3780_s4] sm:$0xf] }
 0x1e7   :  { %2070 = vmatprep.subr.bf16.mxu0 %v3375_v13  ;;  %2234 = vmatprep.subr.bf16.mxu1 %v3378_v14  ;;  %v628_v52 = vrot.slane %v623_v11, %v100_v23  ;;  %v636_v13 = vrot.slane %v623_v11, %v108_v45  ;;  %v632_v14 = vrot.slane %v623_v11, %v104_v25 }
 0x1ea   :  { %2071 = vmatpush1.bf16.msra.mxu0 %v3373_v15  ;;  %2235 = vmatpush1.bf16.msra.mxu1 %v3376_v16  ;;  %v640_v15 = vrot.slane %v623_v11, %v112_v26 }
 0x1eb   :  { %2072 = vmatprep.subr.bf16.mxu0 %v3381_v17  ;;  %2236 = vmatprep.subr.bf16.mxu1 %v3384_v18 }
 0x1ee   :  { %2073 = vmatpush1.bf16.msra.mxu0 %v3379_v19  ;;  %2237 = vmatpush1.bf16.msra.mxu1 %v3382_v20 }
 0x1ef   :  { %2074 = vmatprep.subr.bf16.mxu0 %v3387_v27  ;;  %2238 = vmatprep.subr.bf16.mxu1 %v3390_v28 }
 0x1f2   :  { %2075 = vmatpush1.bf16.msra.mxu0 %v3385_v29  ;;  %2239 = vmatpush1.bf16.msra.mxu1 %v3388_v51 }
 0x1f3   :  { %2076 = vmatprep.subr.bf16.mxu0 %v3393_v31  ;;  %2240 = vmatprep.subr.bf16.mxu1 %v3396_v32 }
 0x1f6   :  { %2077 = vmatpush1.bf16.msra.mxu0 %v3391_v34  ;;  %2241 = vmatpush1.bf16.msra.mxu1 %v3394_v35 }
 0x1f7   :  { %2078 = vmatprep.subr.bf16.mxu0 %v3399_v36  ;;  %2242 = vmatprep.subr.bf16.mxu1 %v3402_v37  ;;  %v2895_v37 = vld [vmem:[%s3782_s6] ss:$0 sm:$0xff] }
 0x1fa   :  { %2079 = vmatpush1.bf16.msra.mxu0 %v3397_v38  ;;  %2243 = vmatpush1.bf16.msra.mxu1 %v3400_v39 }
 0x1fb   :  { %2928 = vmatprep.subr.bf16.mxu0 %v3403_v24  ;;  %2950 = vmatprep.subr.bf16.mxu1 %v3404_v41 }
 0x1fd   :  { %2081 = vmatmul.mubr.bf16.vlgmr.msra.gmra.mrb[8].mxu0 %v365_v44  ;;  %2245 = vmatmul.mubr.bf16.vlgmr.msra.gmra.mrb[8].mxu1 %v365_v44 }
 0x1fe   :  { %2929 = vmatpush3.bf16.msra.mxu0 %v3405_v42  ;;  %2951 = vmatpush3.bf16.msra.mxu1 %v3406_v43 }
 0x1ff   :  { %2930 = vmatprep.subr.bf16.mxu0 %v3407_v9  ;;  %2952 = vmatprep.subr.bf16.mxu1 %v3408_v46 }
 0x202   :  { %2931 = vmatpush3.bf16.msra.mxu0 %v3409_v47  ;;  %2953 = vmatpush3.bf16.msra.mxu1 %v3410_v48 }
 0x203   :  { %2932 = vmatprep.subr.bf16.mxu0 %v3411_v49  ;;  %2954 = vmatprep.subr.bf16.mxu1 %v3412_v50 }
 0x206   :  { %2933 = vmatpush3.bf16.msra.mxu0 %v3413_v53  ;;  %2955 = vmatpush3.bf16.msra.mxu1 %v3414_v54 }
 0x207   :  { %2934 = vmatprep.subr.bf16.mxu0 %v3415_v55  ;;  %2956 = vmatprep.subr.bf16.mxu1 %v3416_v56 }
 0x20a   :  { %2935 = vmatpush3.bf16.msra.mxu0 %v3417_v57  ;;  %2957 = vmatpush3.bf16.msra.mxu1 %v3418_v58 }
 0x20b   :  { %2936 = vmatprep.subr.bf16.mxu0 %v3419_v59  ;;  %2958 = vmatprep.subr.bf16.mxu1 %v3420_v60 }
 0x20e   :  { %2937 = vmatpush3.bf16.msra.mxu0 %v3421_v61  ;;  %2959 = vmatpush3.bf16.msra.mxu1 %v3422_v62 }
 0x20f   :  { %2938 = vmatprep.subr.bf16.mxu0 %v3423_v63  ;;  %2960 = vmatprep.subr.bf16.mxu1 %v3424_v0 }
 0x212   :  { %2939 = vmatpush3.bf16.msra.mxu0 %v3425_v1  ;;  %2961 = vmatpush3.bf16.msra.mxu1 %v3426_v2 }
 0x213   :  { %2940 = vmatprep.subr.bf16.mxu0 %v3427_v3  ;;  %2962 = vmatprep.subr.bf16.mxu1 %v3428_v4 }
 0x216   :  { %2941 = vmatpush3.bf16.msra.mxu0 %v3429_v5  ;;  %2963 = vmatpush3.bf16.msra.mxu1 %v3430_v33 }
 0x217   :  { %2942 = vmatprep.subr.bf16.mxu0 %v3431_v6  ;;  %2964 = vmatprep.subr.bf16.mxu1 %v3432_v7 }
 0x21a   :  { %2943 = vmatpush3.bf16.msra.mxu0 %v3433_v8  ;;  %2965 = vmatpush3.bf16.msra.mxu1 %v3434_v10 }
 0x2d0   :  { %v2082_v16 = vpop.f32.mrb[8].mxu0  ;;  %v2246_v17 = vpop.f32.mrb[8].mxu1 }
 0x2d1   :  { %v2972_v18 = vadd.f32 %v2082_v16, %v628_v52  ;;  %v2974_v19 = vadd.f32 %v2246_v17, %v636_v13  ;;  %v2084_v20 = vpop.f32.mrb[9].mxu0  ;;  %v2248_v21 = vpop.f32.mrb[9].mxu1 }
 0x2d2   :  { %v2973_v27 = vadd.f32 %v2084_v20, %v632_v14  ;;  %v2975_v28 = vadd.f32 %v2248_v21, %v640_v15  ;;  %v2086_v29 = vpop.f32.mrb[10].mxu0  ;;  %v2250_v51 = vpop.f32.mrb[10].mxu1 }
 0x2d3   :  { %v2253_v23 = vmax.f32 %v2972_v18, 0.0  ;;  %v2255_v30 = vmax.f32 %v2974_v19, 0.0  ;;  %v2087_v31 = vpop.f32.mrb[11].mxu0  ;;  %v2251_v45 = vpop.f32.mrb[11].mxu1 }
 0x2d4   :  { %v2254_v32 = vmax.f32 %v2973_v27, 0.0  ;;  %v2256_v34 = vmax.f32 %v2975_v28, 0.0 }
 0x2d5   :  { %v2257_v22 = vpack.c.bf16 %v2253_v23, %v2253_v23  ;;  %v2259_v26 = vpack.c.bf16 %v2255_v30, %v2255_v30 }
 0x2d6   :  { %v2258_v25 = vpack.c.bf16 %v2254_v32, %v2254_v32  ;;  %v2260_v35 = vpack.c.bf16 %v2256_v34, %v2256_v34 }
 0x2d8   :  { %2556 = vmatprep.mubr.bf16.mxu0 %v2258_v25  ;;  %2596 = vmatprep.mubr.bf16.mxu1 %v2260_v35 }
 0x2d9   :  { %2557 = vmatmul.mubr.bf16.vlgmr.msra.gmra.mrb[12].mxu0 %v2257_v22  ;;  %2597 = vmatmul.mubr.bf16.vlgmr.msra.gmra.mrb[12].mxu1 %v2259_v26 }
 0x3ac   :  { %v2944_v12 = vpop.f32.mrb[12].mxu0  ;;  %v2966_v36 = vpop.f32.mrb[12].mxu1 }
 0x3ad   :  { %v2945_v38 = vpop.f32.mrb[13].mxu0  ;;  %v2967_v39 = vpop.f32.mrb[13].mxu1 }
 0x3ae   :  { %v2946_v40 = vadd.f32 %v2945_v38, %v2944_v12  ;;  %v2968_v24 = vadd.f32 %v2967_v39, %v2966_v36  ;;  %v2947_v41 = vpop.f32.mrb[14].mxu0  ;;  %v2969_v42 = vpop.f32.mrb[14].mxu1 }
 0x3af   :  { %v2948_v43 = vpop.f32.mrb[15].mxu0  ;;  %v2970_v44 = vpop.f32.mrb[15].mxu1 }
 0x3b0   :  { %v2559_v9 = vadd.f32 %v2946_v40, %v2895_v37 }
 0x3b2   :  { %v2599_v46 = vadd.f32 %v2968_v24, %v2559_v9 }
 0x3b4   :  { %3435 = vtanh.f32 %v2599_v46 }
 0x3be   :  { %v3436_v47 = vpop.eup %3435 }
 0x3bf   :  { %2605 = vst [vmem:[#allocation11] sm:$0xff] %v3436_v47 }
 0x3c0   :  { %3558 = shalt.err (!%p3555_p2)
}
 0x3c1   :  { %s3559_s19 = scalar_lea.hbm %s3783_s7, 128 }
 0x3c2   :  { %p3560_p3 = scmp.ne.s32.totalorder %s3783_s7, %s3559_s19  ;;  %p3563_p4 = scmp.lt.u32.totalorder %s3559_s19, %s3783_s7 }
 0x3c4   :  { %p3565_p5 = pnand %p3563_p4, %p3560_p3 }
 0x3c6   :  { %3568 = shalt.err (!%p3565_p5)
}
 0x3c7   :  { %2615 = dma.vmem_to_hbm [thread:$0]  %s2613_s16, 128, %s3783_s7, [#allocation4]  }
 0x3c8   :  { %3575 = dma.done.wait [#allocation4], 128  }
 0x3c9   :  { %3576 = vsyncadd [#allocation4], 4294967168 }
 0x3ca   :  { %2619 = vsyncpa [#allocation3], 1 }
 0x3cb   :  { %2620 = vsyncpa [#allocation6], 1 }
 0x3cc   :  { %2621 = vsyncpa [#allocation9], 1 }
 0x3cd   :  { %2622 = vsyncpa [#allocation4], 1 }

</bundles_post_ra>
